<compile_context>
chip_gen: v7x
topology: tpu7x:2x2x1
jax: 0.10.0
libtpu: 0.0.40
codegen_flags: <defaults>
</compile_context>

<pallas_src>
import math

import jax
import jax.numpy as jnp
from jax import lax
from jax.experimental import pallas as pl
from jax.experimental.pallas import tpu as pltpu

V_THRESHOLD = 1.0   # global_thres
BN_EPS = 1e-5
LANE = 128


# ------------------------------ tiling helpers ------------------------------

def _tile(n, max_tile=512, align=8, pipeline=True):
    """Largest multiple of `align` that divides n and is <= max_tile.
    Falls back to n itself (full extent, always layout-legal).  With
    pipeline=True the tile is additionally capped at n // 2 so the grid gets
    >= 2 steps (HBM<->VMEM pipelining / dual-TC sharding)."""
    cap = min(max_tile, n)
    if pipeline and n >= 2 * align:
        cap = min(cap, n // 2)
    best = 0
    t = align
    while t <= cap:
        if n % t == 0:
            best = t
        t += align
    return best if best > 0 else n


# ------------------------------ Pallas kernels -------------------------------

def if_neuron_kernel(x_ref, o_ref):
    """spikingjelly IFNode, step_mode='m', on a lane-dense (T, rows, 128) tile:
    v starts at 0; v += x[t]; spike = (v >= v_th); hard reset to v_reset=0.
    Spikes are stored in o_ref.dtype (bf16) — exact for 0/1 values."""
    T = x_ref.shape[0]

    def step(t, v):
        v = v + x_ref[t]
        s = (v >= V_THRESHOLD).astype(jnp.float32)
        o_ref[t] = s.astype(o_ref.dtype)
        return v * (1.0 - s)                     # hard reset

    v0 = jnp.zeros(x_ref.shape[1:], jnp.float32)
    if T <= 8:                                   # small T: full unroll
        v = v0
        for t in range(T):
            v = step(t, v)
    else:                                        # large T: bounded vreg pressure
        lax.fori_loop(0, T, step, v0)


def matmul_tsm_kernel(tsm_ref, x_ref, w_ref, b_ref, o_ref):
    """o = (x @ w + bias) * tsm[t] — conv-as-matmul / linear on the MXU.
    tsm_ref is an SMEM (T,) scalar-prefetch array (one scale per timestep).
    TODO(synk): add a K grid axis + f32 accumulator for very large K so the
    same kernel fits v7x's 64 MiB VMEM."""
    t = pl.program_id(0)
    y = jnp.dot(x_ref[...], w_ref[...], preferred_element_type=jnp.float32)
    o_ref[...] = (y + b_ref[...]) * tsm_ref[t]


def bn_stats_kernel(y_ref, sum_ref, sq_ref):
    """Tiled per-column sum / sum-of-squares accumulator (reduction axis
    'arbitrary', output block resident in VMEM across the grid)."""
    @pl.when(pl.program_id(0) == 0)
    def _():
        sum_ref[...] = jnp.zeros_like(sum_ref)
        sq_ref[...] = jnp.zeros_like(sq_ref)

    y = y_ref[...]
    sum_ref[...] += jnp.sum(y, axis=0, keepdims=True)
    sq_ref[...] += jnp.sum(y * y, axis=0, keepdims=True)


def bn_temb_if_kernel(y_ref, mean_ref, var_ref, g_ref, b_ref, te_ref, o_ref):
    """Fused: train-mode BN normalize + per-image temb add + multi-step IF
    neuron.  y_ref: (T, tr, width) conv1 output; te_ref: (T, 1, width) temb
    projection for this image (broadcast over the tile); o_ref: bf16 spikes."""
    T = y_ref.shape[0]
    inv = g_ref[...] * lax.rsqrt(var_ref[...] + BN_EPS)         # (1, width)
    shift = b_ref[...] - mean_ref[...] * inv                    # (1, width)

    def step(t, v):
        h = y_ref[t] * inv + shift + te_ref[t]                  # (tr, width)
        v = v + h
        s = (v >= V_THRESHOLD).astype(jnp.float32)
        o_ref[t] = s.astype(o_ref.dtype)
        return v * (1.0 - s)                                    # hard reset

    v0 = jnp.zeros(y_ref.shape[1:], jnp.float32)
    if T <= 8:
        v = v0
        for t in range(T):
            v = step(t, v)
    else:
        lax.fori_loop(0, T, step, v0)


def bn_norm_add_kernel(y_ref, mean_ref, var_ref, g_ref, b_ref, a_ref, o_ref):
    """Training-mode BN normalize (biased batch stats) + elementwise residual
    add, in the precomputed scale/shift form."""
    inv = g_ref[...] * lax.rsqrt(var_ref[...] + BN_EPS)
    shift = b_ref[...] - mean_ref[...] * inv
    o_ref[...] = y_ref[...] * inv + shift + a_ref[...]


# ------------------------------ kernel wrappers ------------------------------

def if_neuron(x, out_dtype=jnp.bfloat16):
    """x: (T, L) membrane inputs -> (T, L) spikes (out_dtype), lane-dense."""
    T, L = x.shape
    block = 16 * LANE                                  # rows % 16 (bf16 output)
    Lp = ((L + block - 1) // block) * block
    if Lp != L:
        x = jnp.pad(x, ((0, 0), (0, Lp - L)))          # pads never spike
    R = Lp // LANE
    tr = _tile(R, 512, 16)
    xr = x.reshape(T, R, LANE)
    out = pl.pallas_call(
        if_neuron_kernel,
        out_shape=jax.ShapeDtypeStruct((T, R, LANE), out_dtype),
        grid=(R // tr,),
        in_specs=[pl.BlockSpec((T, tr, LANE), lambda i: (0, i, 0))],
        out_specs=pl.BlockSpec((T, tr, LANE), lambda i: (0, i, 0)),
        compiler_params=pltpu.CompilerParams(dimension_semantics=("parallel",)),
    )(xr)
    out = out.reshape(T, Lp)
    return out[:, :L] if Lp != L else out


def matmul_tsm(x, w, b, tsm, *, max_tile=256):
    """x: (T, N, K); w: (K, Cout); b: (Cout,); tsm: (T,) per-timestep scale.
    Returns (T, N, Cout) float32.  TSM scale comes from SMEM (scalar prefetch)."""
    T, N, K = x.shape
    Cout = w.shape[1]
    align = 16 if x.dtype == jnp.bfloat16 else 8
    Np = ((N + align - 1) // align) * align            # never degenerate tiles
    if Np != N:
        x = jnp.pad(x, ((0, 0), (0, Np - N), (0, 0)))
    tm = _tile(Np, max_tile, align)
    out = pl.pallas_call(
        matmul_tsm_kernel,
        out_shape=jax.ShapeDtypeStruct((T, Np, Cout), jnp.float32),
        grid_spec=pltpu.PrefetchScalarGridSpec(
            num_scalar_prefetch=1,
            grid=(T, Np // tm),
            in_specs=[
                pl.BlockSpec((None, tm, K), lambda t, i, tsm_ref: (t, i, 0)),
                pl.BlockSpec((K, Cout), lambda t, i, tsm_ref: (0, 0)),
                pl.BlockSpec((1, Cout), lambda t, i, tsm_ref: (0, 0)),
            ],
            out_specs=pl.BlockSpec((None, tm, Cout),
                                   lambda t, i, tsm_ref: (t, i, 0)),
        ),
        compiler_params=pltpu.CompilerParams(
            dimension_semantics=("parallel", "parallel")),
    )(tsm.astype(jnp.float32), x, w, b.reshape(1, Cout).astype(jnp.float32))
    return out[:, :N, :] if Np != N else out


def bn_batch_stats(y2d):
    """y2d: (rows, cols) f32 -> (sum, sum_of_squares) per column, each (1, cols)."""
    rows, cols = y2d.shape
    tm = _tile(rows, 1024, 8)
    s, sq = pl.pallas_call(
        bn_stats_kernel,
        out_shape=(jax.ShapeDtypeStruct((1, cols), jnp.float32),
                   jax.ShapeDtypeStruct((1, cols), jnp.float32)),
        grid=(rows // tm,),
        in_specs=[pl.BlockSpec((tm, cols), lambda i: (i, 0))],
        out_specs=(pl.BlockSpec((1, cols), lambda i: (0, 0)),
                   pl.BlockSpec((1, cols), lambda i: (0, 0))),
        compiler_params=pltpu.CompilerParams(dimension_semantics=("arbitrary",)),
    )(y2d)
    return s, sq


def bn_train_stats(y_flat, C):
    """Per-channel biased batch stats (train-mode BN) of y_flat: (rows, C)."""
    rows = y_flat.shape[0]
    if C <= LANE and LANE % C == 0 and (rows * C) % LANE == 0:
        # lane-dense reduction: fold 128//C pixels per 128-lane row
        rep = LANE // C
        s, sq = bn_batch_stats(y_flat.reshape(rows * C // LANE, LANE))
        s = s.reshape(rep, C).sum(axis=0, keepdims=True)
        sq = sq.reshape(rep, C).sum(axis=0, keepdims=True)
    else:
        s, sq = bn_batch_stats(y_flat)
    mean = s / rows
    var = jnp.maximum(sq / rows - mean * mean, 0.0)
    return mean, var


def bn_temb_if(y, te, mean, var, gamma, beta, *, T, B, HW, C,
               out_dtype=jnp.bfloat16):
    """Fused BN1 normalize + temb add (per image) + IF neuron2.
    y: (T, B*HW, C) f32 conv1 output; te: (T, B, C) temb projection;
    mean/var/gamma/beta: (1, C).  Returns spikes (T, B*HW, C) in out_dtype."""
    lane_dense = (C <= LANE and LANE % C == 0 and (HW * C) % LANE == 0)
    if lane_dense:
        rep = LANE // C
        rows = HW * C // LANE
        width = LANE
        yv = y.reshape(T, B, rows, LANE)
        tev = jnp.tile(te.reshape(T, B, 1, C), (1, 1, 1, rep))
        pm = jnp.tile(mean, (1, rep)); pv = jnp.tile(var, (1, rep))
        pg = jnp.tile(gamma, (1, rep)); pb = jnp.tile(beta, (1, rep))
    else:
        rows, width = HW, C
        yv = y.reshape(T, B, HW, C)
        tev = te.reshape(T, B, 1, C)
        pm, pv, pg, pb = mean, var, gamma, beta

    tr = _tile(rows, 512, 16)
    out = pl.pallas_call(
        bn_temb_if_kernel,
        out_shape=jax.ShapeDtypeStruct((T, B, rows, width), out_dtype),
        grid=(B, rows // tr),
        in_specs=[
            pl.BlockSpec((T, None, tr, width), lambda b, i: (0, b, i, 0)),
            pl.BlockSpec((1, width), lambda b, i: (0, 0)),
            pl.BlockSpec((1, width), lambda b, i: (0, 0)),
            pl.BlockSpec((1, width), lambda b, i: (0, 0)),
            pl.BlockSpec((1, width), lambda b, i: (0, 0)),
            pl.BlockSpec((T, None, 1, width), lambda b, i: (0, b, 0, 0)),
        ],
        out_specs=pl.BlockSpec((T, None, tr, width), lambda b, i: (0, b, i, 0)),
        compiler_params=pltpu.CompilerParams(
            dimension_semantics=("parallel", "parallel")),
    )(yv, pm, pv, pg, pb, tev)
    return out.reshape(T, B * HW, C)


def bn_norm_add(y_flat, add_flat, mean, var, gamma, beta, C):
    """Train-mode BN normalize + full residual add.
    y_flat/add_flat: (rows, C); mean/var/gamma/beta: (1, C).  f32 output."""
    rows_total = y_flat.shape[0]
    lane_dense = (C <= LANE and LANE % C == 0 and (rows_total * C) % LANE == 0)
    if lane_dense:
        rep = LANE // C
        R = rows_total * C // LANE
        width = LANE
        yv = y_flat.reshape(R, LANE)
        av = add_flat.reshape(R, LANE)
        pm = jnp.tile(mean, (1, rep)); pv = jnp.tile(var, (1, rep))
        pg = jnp.tile(gamma, (1, rep)); pb = jnp.tile(beta, (1, rep))
    else:
        R, width = rows_total, C
        yv, av = y_flat, add_flat
        pm, pv, pg, pb = mean, var, gamma, beta

    tr = _tile(R, 1024, 8)
    out = pl.pallas_call(
        bn_norm_add_kernel,
        out_shape=jax.ShapeDtypeStruct((R, width), jnp.float32),
        grid=(R // tr,),
        in_specs=[
            pl.BlockSpec((tr, width), lambda i: (i, 0)),
            pl.BlockSpec((1, width), lambda i: (0, 0)),
            pl.BlockSpec((1, width), lambda i: (0, 0)),
            pl.BlockSpec((1, width), lambda i: (0, 0)),
            pl.BlockSpec((1, width), lambda i: (0, 0)),
            pl.BlockSpec((tr, width), lambda i: (i, 0)),
        ],
        out_specs=pl.BlockSpec((tr, width), lambda i: (i, 0)),
        compiler_params=pltpu.CompilerParams(dimension_semantics=("parallel",)),
    )(yv, pm, pv, pg, pb, av)
    return out.reshape(rows_total, C)


# ----------------------------------- glue ------------------------------------

def im2col3x3(x):
    """x: (N, H, W, C) -> (N*H*W, 9*C) patches for a 3x3 / pad=1 / stride=1 conv.
    Spikes arrive here already in bf16 (exact 0/1) to halve HBM bytes.
    # TODO(synk): replace with an in-kernel 9-tap accumulation over a padded
    # (H+2, W+2, C) VMEM block to remove the ~9x patch materialization at real sizes.
    """
    N, H, W, C = x.shape
    xp = jnp.pad(x, ((0, 0), (1, 1), (1, 1), (0, 0)))
    cols = [xp[:, ky:ky + H, kx:kx + W, :] for ky in range(3) for kx in range(3)]
    return jnp.concatenate(cols, axis=-1).reshape(N * H * W, 9 * C)


def init_params(key, in_ch, out_ch, tdim, T):
    """Deterministic init matching the module: xavier_uniform weights, zero
    biases, TSM params = 1, BN gamma=1 / beta=0 (train-mode stats computed)."""
    ks = jax.random.split(key, 4)

    def xavier(k, shape, fan_in, fan_out):
        bound = math.sqrt(6.0 / (fan_in + fan_out))
        return jax.random.uniform(k, shape, jnp.float32, -bound, bound)

    p = {
        'w1': xavier(ks[0], (3, 3, in_ch, out_ch), in_ch * 9, out_ch * 9),  # HWIO
        'b1': jnp.zeros((out_ch,), jnp.float32),
        'tsmp1': jnp.ones((T,), jnp.float32),
        'g1': jnp.ones((out_ch,), jnp.float32),
        'be1': jnp.zeros((out_ch,), jnp.float32),
        'w2': xavier(ks[1], (3, 3, out_ch, out_ch), out_ch * 9, out_ch * 9),
        'b2': jnp.zeros((out_ch,), jnp.float32),
        'tsmp2': jnp.ones((T,), jnp.float32),
        'g2': jnp.ones((out_ch,), jnp.float32),
        'be2': jnp.zeros((out_ch,), jnp.float32),
        'wt': xavier(ks[2], (tdim, out_ch), tdim, out_ch),   # temb_proj Linear
        'bt': jnp.zeros((out_ch,), jnp.float32),
    }
    if in_ch != out_ch:   # 1x1 TSM shortcut conv
        p['wsc'] = xavier(ks[3], (in_ch, out_ch), in_ch, out_ch)
        p['bsc'] = jnp.zeros((out_ch,), jnp.float32)
        p['tsmpsc'] = jnp.ones((T,), jnp.float32)
    return p


def spk_resblock_forward(x, temb, p):
    """x: (T, B, C_in, H, W), temb: (T, B, tdim) -> (T, B, C_out, H, W).
    attn=False -> Identity; dropout unused in forward."""
    T, B, Cin, H, W = x.shape
    Cout = p['w1'].shape[-1]
    N = B * H * W
    HW = H * W
    TB = T * B

    x_cl = jnp.transpose(x, (0, 1, 3, 4, 2))                 # (T, B, H, W, Cin)
    x_flat = x_cl.reshape(T, N, Cin)

    # ---- neuron1: multi-step IF (lane-dense tiled kernel, bf16 spikes) ----
    s1 = if_neuron(x_flat.reshape(T, N * Cin))               # (T, N*Cin) bf16
    s1_img = s1.reshape(TB, H, W, Cin)

    # ---- conv1: 3x3 pad=1 as im2col (bf16) + MXU matmul; TSM scale from SMEM ----
    patches1 = im2col3x3(s1_img).reshape(T, N, 9 * Cin)
    y1 = matmul_tsm(patches1,
                    p['w1'].reshape(9 * Cin, Cout).astype(jnp.bfloat16),
                    p['b1'], p['tsmp1'])                      # (T, N, Cout) f32

    # ---- temb projection: Swish -> Linear (kept f32; LHS is not 0/1 spikes) ----
    temb_sw = temb * jax.nn.sigmoid(temb)                     # (T, B, tdim)
    te = matmul_tsm(temb_sw, p['wt'], p['bt'], jnp.ones((T,), jnp.float32))
    te = te.reshape(T, B, Cout)

    # ---- bn1 stats + fused BN-normalize + temb add + neuron2 (bf16 spikes) ----
    m1, v1 = bn_train_stats(y1.reshape(TB * HW, Cout), Cout)
    s2 = bn_temb_if(y1, te, m1, v1,
                    p['g1'].reshape(1, Cout), p['be1'].reshape(1, Cout),
                    T=T, B=B, HW=HW, C=Cout)                  # (T, N, Cout) bf16
    s2_img = s2.reshape(TB, H, W, Cout)

    # ---- conv2: 3x3 pad=1 ----
    patches2 = im2col3x3(s2_img).reshape(T, N, 9 * Cout)
    y2 = matmul_tsm(patches2,
                    p['w2'].reshape(9 * Cout, Cout).astype(jnp.bfloat16),
                    p['b2'], p['tsmp2'])                      # (T, N, Cout) f32

    # ---- shortcut: 1x1 TSM conv (in_ch != out_ch) or identity ----
    if 'wsc' in p:
        sc = matmul_tsm(x_flat, p['wsc'], p['bsc'], p['tsmpsc'])   # (T, N, Cout)
    else:
        sc = x_flat
    sc = sc.reshape(TB * HW, Cout)

    # ---- bn2 + residual add   (attn=False -> Identity) ----
    y2f = y2.reshape(TB * HW, Cout)
    m2, v2 = bn_train_stats(y2f, Cout)
    out = bn_norm_add(y2f, sc, m2, v2,
                      p['g2'].reshape(1, Cout), p['be2'].reshape(1, Cout), Cout)

    out = out.reshape(T, B, H, W, Cout)
    return jnp.transpose(out, (0, 1, 4, 2, 3))                # (T, B, Cout, H, W)


# ----------------------------------- main ------------------------------------

if __name__ == "__main__":
    T, B, in_ch, out_ch, H, W, tdim = 4, 2, 4, 8, 16, 16, 32

    key = jax.random.PRNGKey(0)
    kx, kt, kp = jax.random.split(key, 3)
    x = jax.random.normal(kx, (T, B, in_ch, H, W), jnp.float32)
    temb = jax.random.normal(kt, (T, B, tdim), jnp.float32)
    params = init_params(kp, in_ch, out_ch, tdim, T)

    fwd = jax.jit(spk_resblock_forward)
    out = jax.block_until_ready(fwd(x, temb, params))

    assert out.shape == (T, B, out_ch, H, W)
    assert bool(jnp.all(jnp.isfinite(out)))
    print("KERNEL_OK")
</pallas_src>

<mosaic_0001>
module attributes {stable_mosaic.version = 11 : i64} {
  func.func @matmul_tsm_kernel(%arg0: i32, %arg1: i32, %arg2: memref<4xf32, #tpu.memory_space<smem>>, %arg3: memref<1x8x32xf32, #tpu.memory_space<vmem>>, %arg4: memref<32x8xf32, #tpu.memory_space<vmem>>, %arg5: memref<1x8xf32, #tpu.memory_space<vmem>>, %arg6: memref<1x8x8xf32, #tpu.memory_space<vmem>>) attributes {dimension_semantics = [#tpu.dimension_semantics<parallel>, #tpu.dimension_semantics<parallel>], iteration_bounds = array<i64: 4, 1>, scalar_prefetch = 1 : i64, scratch_operands = 0 : i64, tpu.core_type = #tpu.core_type<tc>, window_params = [{transform_indices = @transform_0, window_bounds = array<i64: 1, 8, 32>}, {pipeline_mode = #tpu.pipeline_mode<synchronous>, transform_indices = @transform_1, window_bounds = array<i64: 32, 8>}, {pipeline_mode = #tpu.pipeline_mode<synchronous>, transform_indices = @transform_2, window_bounds = array<i64: 1, 8>}, {transform_indices = @transform_3, window_bounds = array<i64: 1, 8, 8>}]} {
    %c0 = arith.constant 0 : index
    %c0_0 = arith.constant 0 : index
    %c0_1 = arith.constant 0 : index
    %0 = vector.load %arg3[%c0, %c0_0, %c0_1] : memref<1x8x32xf32, #tpu.memory_space<vmem>>, vector<1x8x32xf32>
    %1 = vector.shape_cast %0 : vector<1x8x32xf32> to vector<8x32xf32>
    %c0_2 = arith.constant 0 : index
    %c0_3 = arith.constant 0 : index
    %2 = vector.load %arg4[%c0_2, %c0_3] : memref<32x8xf32, #tpu.memory_space<vmem>>, vector<32x8xf32>
    %cst = arith.constant dense<0.000000e+00> : vector<8x8xf32>
    %3 = tpu.matmul %1, %2, %cst {dimension_numbers = #tpu.dot_dimension_numbers<[1], [0], [0], [1], [0, 0, 1, 1], [], []>} : vector<8x32xf32>, vector<32x8xf32>, vector<8x8xf32> -> vector<8x8xf32>
    %c0_4 = arith.constant 0 : index
    %c0_5 = arith.constant 0 : index
    %4 = vector.load %arg5[%c0_4, %c0_5] : memref<1x8xf32, #tpu.memory_space<vmem>>, vector<1x8xf32>
    %5 = vector.broadcast %4 : vector<1x8xf32> to vector<8x8xf32>
    %6 = arith.addf %3, %5 : vector<8x8xf32>
    %7 = arith.index_cast %arg0 : i32 to index
    %8 = memref.load %arg2[%7] : memref<4xf32, #tpu.memory_space<smem>>
    %9 = vector.broadcast %8 : f32 to vector<8x8xf32>
    %10 = arith.mulf %6, %9 : vector<8x8xf32>
    %c0_6 = arith.constant 0 : index
    %c0_7 = arith.constant 0 : index
    %c0_8 = arith.constant 0 : index
    %11 = vector.load %arg6[%c0_6, %c0_7, %c0_8] : memref<1x8x8xf32, #tpu.memory_space<vmem>>, vector<1x8x8xf32>
    %12 = vector.shape_cast %11 : vector<1x8x8xf32> to vector<8x8xf32>
    %13 = vector.shape_cast %10 : vector<8x8xf32> to vector<1x8x8xf32>
    tpu.vector_store %arg6[%c0_6, %c0_7, %c0_8], %13 {strides = array<i32>} : memref<1x8x8xf32, #tpu.memory_space<vmem>>, vector<1x8x8xf32>,
    return
  }
  func.func @transform_0(%arg0: i32, %arg1: i32, %arg2: memref<4xf32, #tpu.memory_space<smem>>) -> (i32, i32, i32) {
    %c0_i32 = arith.constant 0 : i32
    %c0_i32_0 = arith.constant 0 : i32
    return %arg0, %arg1, %c0_i32 : i32, i32, i32
  }
  func.func @transform_1(%arg0: i32, %arg1: i32, %arg2: memref<4xf32, #tpu.memory_space<smem>>) -> (i32, i32) {
    %c0_i32 = arith.constant 0 : i32
    %c0_i32_0 = arith.constant 0 : i32
    %c0_i32_1 = arith.constant 0 : i32
    return %c0_i32, %c0_i32_0 : i32, i32
  }
  func.func @transform_2(%arg0: i32, %arg1: i32, %arg2: memref<4xf32, #tpu.memory_space<smem>>) -> (i32, i32) {
    %c0_i32 = arith.constant 0 : i32
    %c0_i32_0 = arith.constant 0 : i32
    %c0_i32_1 = arith.constant 0 : i32
    return %c0_i32, %c0_i32_0 : i32, i32
  }
  func.func @transform_3(%arg0: i32, %arg1: i32, %arg2: memref<4xf32, #tpu.memory_space<smem>>) -> (i32, i32, i32) {
    %c0_i32 = arith.constant 0 : i32
    %c0_i32_0 = arith.constant 0 : i32
    return %arg0, %arg1, %c0_i32 : i32, i32, i32
  }
}

module attributes {stable_mosaic.version = 11 : i64} {
  func.func @if_neuron_kernel(%arg0: i32, %arg1: memref<4x16x128xf32, #tpu.memory_space<vmem>>, %arg2: memref<4x16x128xbf16, #tpu.memory_space<vmem>>) attributes {dimension_semantics = [#tpu.dimension_semantics<parallel>], iteration_bounds = array<i64: 1>, scalar_prefetch = 0 : i64, scratch_operands = 0 : i64, tpu.core_type = #tpu.core_type<tc>, window_params = [{transform_indices = @transform_0, window_bounds = array<i64: 4, 16, 128>}, {transform_indices = @transform_1, window_bounds = array<i64: 4, 16, 128>}]} {
    %cst = arith.constant 0.000000e+00 : f32
    %0 = vector.broadcast %cst : f32 to vector<16x128xf32>
    %c0 = arith.constant 0 : index
    %c0_0 = arith.constant 0 : index
    %c0_1 = arith.constant 0 : index
    %1 = vector.load %arg1[%c0, %c0_0, %c0_1] : memref<4x16x128xf32, #tpu.memory_space<vmem>>, vector<1x16x128xf32>
    %2 = vector.shape_cast %1 : vector<1x16x128xf32> to vector<16x128xf32>
    %3 = arith.addf %0, %2 : vector<16x128xf32>
    %cst_2 = arith.constant 1.000000e+00 : f32
    %4 = vector.broadcast %cst_2 : f32 to vector<16x128xf32>
    %5 = arith.cmpf oge, %3, %4 : vector<16x128xf32>
    %6 = arith.extui %5 : vector<16x128xi1> to vector<16x128xi32>
    %7 = arith.sitofp %6 : vector<16x128xi32> to vector<16x128xf32>
    %8 = arith.truncf %7 : vector<16x128xf32> to vector<16x128xbf16>
    %c0_3 = arith.constant 0 : index
    %c0_4 = arith.constant 0 : index
    %c0_5 = arith.constant 0 : index
    %9 = vector.load %arg2[%c0_3, %c0_4, %c0_5] : memref<4x16x128xbf16, #tpu.memory_space<vmem>>, vector<1x16x128xbf16>
    %10 = vector.shape_cast %9 : vector<1x16x128xbf16> to vector<16x128xbf16>
    %11 = vector.shape_cast %8 : vector<16x128xbf16> to vector<1x16x128xbf16>
    tpu.vector_store %arg2[%c0_3, %c0_4, %c0_5], %11 {strides = array<i32>} : memref<4x16x128xbf16, #tpu.memory_space<vmem>>, vector<1x16x128xbf16>,
    %cst_6 = arith.constant 1.000000e+00 : f32
    %12 = vector.broadcast %cst_6 : f32 to vector<16x128xf32>
    %13 = arith.subf %12, %7 : vector<16x128xf32>
    %14 = arith.mulf %3, %13 : vector<16x128xf32>
    %c1 = arith.constant 1 : index
    %c0_7 = arith.constant 0 : index
    %c0_8 = arith.constant 0 : index
    %15 = vector.load %arg1[%c1, %c0_7, %c0_8] : memref<4x16x128xf32, #tpu.memory_space<vmem>>, vector<1x16x128xf32>
    %16 = vector.shape_cast %15 : vector<1x16x128xf32> to vector<16x128xf32>
    %17 = arith.addf %14, %16 : vector<16x128xf32>
    %cst_9 = arith.constant 1.000000e+00 : f32
    %18 = vector.broadcast %cst_9 : f32 to vector<16x128xf32>
    %19 = arith.cmpf oge, %17, %18 : vector<16x128xf32>
    %20 = arith.extui %19 : vector<16x128xi1> to vector<16x128xi32>
    %21 = arith.sitofp %20 : vector<16x128xi32> to vector<16x128xf32>
    %22 = arith.truncf %21 : vector<16x128xf32> to vector<16x128xbf16>
    %c1_10 = arith.constant 1 : index
    %c0_11 = arith.constant 0 : index
    %c0_12 = arith.constant 0 : index
    %23 = vector.load %arg2[%c1_10, %c0_11, %c0_12] : memref<4x16x128xbf16, #tpu.memory_space<vmem>>, vector<1x16x128xbf16>
    %24 = vector.shape_cast %23 : vector<1x16x128xbf16> to vector<16x128xbf16>
    %25 = vector.shape_cast %22 : vector<16x128xbf16> to vector<1x16x128xbf16>
    tpu.vector_store %arg2[%c1_10, %c0_11, %c0_12], %25 {strides = array<i32>} : memref<4x16x128xbf16, #tpu.memory_space<vmem>>, vector<1x16x128xbf16>,
    %cst_13 = arith.constant 1.000000e+00 : f32
    %26 = vector.broadcast %cst_13 : f32 to vector<16x128xf32>
    %27 = arith.subf %26, %21 : vector<16x128xf32>
    %28 = arith.mulf %17, %27 : vector<16x128xf32>
    %c2 = arith.constant 2 : index
    %c0_14 = arith.constant 0 : index
    %c0_15 = arith.constant 0 : index
    %29 = vector.load %arg1[%c2, %c0_14, %c0_15] : memref<4x16x128xf32, #tpu.memory_space<vmem>>, vector<1x16x128xf32>
    %30 = vector.shape_cast %29 : vector<1x16x128xf32> to vector<16x128xf32>
    %31 = arith.addf %28, %30 : vector<16x128xf32>
    %cst_16 = arith.constant 1.000000e+00 : f32
    %32 = vector.broadcast %cst_16 : f32 to vector<16x128xf32>
    %33 = arith.cmpf oge, %31, %32 : vector<16x128xf32>
    %34 = arith.extui %33 : vector<16x128xi1> to vector<16x128xi32>
    %35 = arith.sitofp %34 : vector<16x128xi32> to vector<16x128xf32>
    %36 = arith.truncf %35 : vector<16x128xf32> to vector<16x128xbf16>
    %c2_17 = arith.constant 2 : index
    %c0_18 = arith.constant 0 : index
    %c0_19 = arith.constant 0 : index
    %37 = vector.load %arg2[%c2_17, %c0_18, %c0_19] : memref<4x16x128xbf16, #tpu.memory_space<vmem>>, vector<1x16x128xbf16>
    %38 = vector.shape_cast %37 : vector<1x16x128xbf16> to vector<16x128xbf16>
    %39 = vector.shape_cast %36 : vector<16x128xbf16> to vector<1x16x128xbf16>
    tpu.vector_store %arg2[%c2_17, %c0_18, %c0_19], %39 {strides = array<i32>} : memref<4x16x128xbf16, #tpu.memory_space<vmem>>, vector<1x16x128xbf16>,
    %cst_20 = arith.constant 1.000000e+00 : f32
    %40 = vector.broadcast %cst_20 : f32 to vector<16x128xf32>
    %41 = arith.subf %40, %35 : vector<16x128xf32>
    %42 = arith.mulf %31, %41 : vector<16x128xf32>
    %c3 = arith.constant 3 : index
    %c0_21 = arith.constant 0 : index
    %c0_22 = arith.constant 0 : index
    %43 = vector.load %arg1[%c3, %c0_21, %c0_22] : memref<4x16x128xf32, #tpu.memory_space<vmem>>, vector<1x16x128xf32>
    %44 = vector.shape_cast %43 : vector<1x16x128xf32> to vector<16x128xf32>
    %45 = arith.addf %42, %44 : vector<16x128xf32>
    %cst_23 = arith.constant 1.000000e+00 : f32
    %46 = vector.broadcast %cst_23 : f32 to vector<16x128xf32>
    %47 = arith.cmpf oge, %45, %46 : vector<16x128xf32>
    %48 = arith.extui %47 : vector<16x128xi1> to vector<16x128xi32>
    %49 = arith.sitofp %48 : vector<16x128xi32> to vector<16x128xf32>
    %50 = arith.truncf %49 : vector<16x128xf32> to vector<16x128xbf16>
    %c3_24 = arith.constant 3 : index
    %c0_25 = arith.constant 0 : index
    %c0_26 = arith.constant 0 : index
    %51 = vector.load %arg2[%c3_24, %c0_25, %c0_26] : memref<4x16x128xbf16, #tpu.memory_space<vmem>>, vector<1x16x128xbf16>
    %52 = vector.shape_cast %51 : vector<1x16x128xbf16> to vector<16x128xbf16>
    %53 = vector.shape_cast %50 : vector<16x128xbf16> to vector<1x16x128xbf16>
    tpu.vector_store %arg2[%c3_24, %c0_25, %c0_26], %53 {strides = array<i32>} : memref<4x16x128xbf16, #tpu.memory_space<vmem>>, vector<1x16x128xbf16>,
    return
  }
  func.func @transform_0(%arg0: i32) -> (i32, i32, i32) {
    %c0_i32 = arith.constant 0 : i32
    %c0_i32_0 = arith.constant 0 : i32
    %c0_i32_1 = arith.constant 0 : i32
    return %c0_i32, %arg0, %c0_i32_0 : i32, i32, i32
  }
  func.func @transform_1(%arg0: i32) -> (i32, i32, i32) {
    %c0_i32 = arith.constant 0 : i32
    %c0_i32_0 = arith.constant 0 : i32
    %c0_i32_1 = arith.constant 0 : i32
    return %c0_i32, %arg0, %c0_i32_0 : i32, i32, i32
  }
}

module attributes {stable_mosaic.version = 11 : i64} {
  func.func @matmul_tsm_kernel(%arg0: i32, %arg1: i32, %arg2: memref<4xf32, #tpu.memory_space<smem>>, %arg3: memref<1x256x4xf32, #tpu.memory_space<vmem>>, %arg4: memref<4x8xf32, #tpu.memory_space<vmem>>, %arg5: memref<1x8xf32, #tpu.memory_space<vmem>>, %arg6: memref<1x256x8xf32, #tpu.memory_space<vmem>>) attributes {dimension_semantics = [#tpu.dimension_semantics<parallel>, #tpu.dimension_semantics<parallel>], iteration_bounds = array<i64: 4, 2>, scalar_prefetch = 1 : i64, scratch_operands = 0 : i64, tpu.core_type = #tpu.core_type<tc>, window_params = [{transform_indices = @transform_0, window_bounds = array<i64: 1, 256, 4>}, {pipeline_mode = #tpu.pipeline_mode<synchronous>, transform_indices = @transform_1, window_bounds = array<i64: 4, 8>}, {pipeline_mode = #tpu.pipeline_mode<synchronous>, transform_indices = @transform_2, window_bounds = array<i64: 1, 8>}, {transform_indices = @transform_3, window_bounds = array<i64: 1, 256, 8>}]} {
    %c0 = arith.constant 0 : index
    %c0_0 = arith.constant 0 : index
    %c0_1 = arith.constant 0 : index
    %0 = vector.load %arg3[%c0, %c0_0, %c0_1] : memref<1x256x4xf32, #tpu.memory_space<vmem>>, vector<1x256x4xf32>
    %1 = vector.shape_cast %0 : vector<1x256x4xf32> to vector<256x4xf32>
    %c0_2 = arith.constant 0 : index
    %c0_3 = arith.constant 0 : index
    %2 = vector.load %arg4[%c0_2, %c0_3] : memref<4x8xf32, #tpu.memory_space<vmem>>, vector<4x8xf32>
    %cst = arith.constant dense<0.000000e+00> : vector<256x8xf32>
    %3 = tpu.matmul %1, %2, %cst {dimension_numbers = #tpu.dot_dimension_numbers<[1], [0], [0], [1], [0, 0, 1, 1], [], []>} : vector<256x4xf32>, vector<4x8xf32>, vector<256x8xf32> -> vector<256x8xf32>
    %c0_4 = arith.constant 0 : index
    %c0_5 = arith.constant 0 : index
    %4 = vector.load %arg5[%c0_4, %c0_5] : memref<1x8xf32, #tpu.memory_space<vmem>>, vector<1x8xf32>
    %5 = vector.broadcast %4 : vector<1x8xf32> to vector<256x8xf32>
    %6 = arith.addf %3, %5 : vector<256x8xf32>
    %7 = arith.index_cast %arg0 : i32 to index
    %8 = memref.load %arg2[%7] : memref<4xf32, #tpu.memory_space<smem>>
    %9 = vector.broadcast %8 : f32 to vector<256x8xf32>
    %10 = arith.mulf %6, %9 : vector<256x8xf32>
    %c0_6 = arith.constant 0 : index
    %c0_7 = arith.constant 0 : index
    %c0_8 = arith.constant 0 : index
    %11 = vector.load %arg6[%c0_6, %c0_7, %c0_8] : memref<1x256x8xf32, #tpu.memory_space<vmem>>, vector<1x256x8xf32>
    %12 = vector.shape_cast %11 : vector<1x256x8xf32> to vector<256x8xf32>
    %13 = vector.shape_cast %10 : vector<256x8xf32> to vector<1x256x8xf32>
    tpu.vector_store %arg6[%c0_6, %c0_7, %c0_8], %13 {strides = array<i32>} : memref<1x256x8xf32, #tpu.memory_space<vmem>>, vector<1x256x8xf32>,
    return
  }
  func.func @transform_0(%arg0: i32, %arg1: i32, %arg2: memref<4xf32, #tpu.memory_space<smem>>) -> (i32, i32, i32) {
    %c0_i32 = arith.constant 0 : i32
    %c0_i32_0 = arith.constant 0 : i32
    return %arg0, %arg1, %c0_i32 : i32, i32, i32
  }
  func.func @transform_1(%arg0: i32, %arg1: i32, %arg2: memref<4xf32, #tpu.memory_space<smem>>) -> (i32, i32) {
    %c0_i32 = arith.constant 0 : i32
    %c0_i32_0 = arith.constant 0 : i32
    %c0_i32_1 = arith.constant 0 : i32
    return %c0_i32, %c0_i32_0 : i32, i32
  }
  func.func @transform_2(%arg0: i32, %arg1: i32, %arg2: memref<4xf32, #tpu.memory_space<smem>>) -> (i32, i32) {
    %c0_i32 = arith.constant 0 : i32
    %c0_i32_0 = arith.constant 0 : i32
    %c0_i32_1 = arith.constant 0 : i32
    return %c0_i32, %c0_i32_0 : i32, i32
  }
  func.func @transform_3(%arg0: i32, %arg1: i32, %arg2: memref<4xf32, #tpu.memory_space<smem>>) -> (i32, i32, i32) {
    %c0_i32 = arith.constant 0 : i32
    %c0_i32_0 = arith.constant 0 : i32
    return %arg0, %arg1, %c0_i32 : i32, i32, i32
  }
}

module attributes {stable_mosaic.version = 11 : i64} {
  func.func @matmul_tsm_kernel(%arg0: i32, %arg1: i32, %arg2: memref<4xf32, #tpu.memory_space<smem>>, %arg3: memref<1x256x36xbf16, #tpu.memory_space<vmem>>, %arg4: memref<36x8xbf16, #tpu.memory_space<vmem>>, %arg5: memref<1x8xf32, #tpu.memory_space<vmem>>, %arg6: memref<1x256x8xf32, #tpu.memory_space<vmem>>) attributes {dimension_semantics = [#tpu.dimension_semantics<parallel>, #tpu.dimension_semantics<parallel>], iteration_bounds = array<i64: 4, 2>, scalar_prefetch = 1 : i64, scratch_operands = 0 : i64, tpu.core_type = #tpu.core_type<tc>, window_params = [{transform_indices = @transform_0, window_bounds = array<i64: 1, 256, 36>}, {pipeline_mode = #tpu.pipeline_mode<synchronous>, transform_indices = @transform_1, window_bounds = array<i64: 36, 8>}, {pipeline_mode = #tpu.pipeline_mode<synchronous>, transform_indices = @transform_2, window_bounds = array<i64: 1, 8>}, {transform_indices = @transform_3, window_bounds = array<i64: 1, 256, 8>}]} {
    %c0 = arith.constant 0 : index
    %c0_0 = arith.constant 0 : index
    %c0_1 = arith.constant 0 : index
    %0 = vector.load %arg3[%c0, %c0_0, %c0_1] : memref<1x256x36xbf16, #tpu.memory_space<vmem>>, vector<1x256x36xbf16>
    %1 = vector.shape_cast %0 : vector<1x256x36xbf16> to vector<256x36xbf16>
    %c0_2 = arith.constant 0 : index
    %c0_3 = arith.constant 0 : index
    %2 = vector.load %arg4[%c0_2, %c0_3] : memref<36x8xbf16, #tpu.memory_space<vmem>>, vector<36x8xbf16>
    %cst = arith.constant dense<0.000000e+00> : vector<256x8xf32>
    %3 = tpu.matmul %1, %2, %cst {dimension_numbers = #tpu.dot_dimension_numbers<[1], [0], [0], [1], [0, 0, 1, 1], [], []>} : vector<256x36xbf16>, vector<36x8xbf16>, vector<256x8xf32> -> vector<256x8xf32>
    %c0_4 = arith.constant 0 : index
    %c0_5 = arith.constant 0 : index
    %4 = vector.load %arg5[%c0_4, %c0_5] : memref<1x8xf32, #tpu.memory_space<vmem>>, vector<1x8xf32>
    %5 = vector.broadcast %4 : vector<1x8xf32> to vector<256x8xf32>
    %6 = arith.addf %3, %5 : vector<256x8xf32>
    %7 = arith.index_cast %arg0 : i32 to index
    %8 = memref.load %arg2[%7] : memref<4xf32, #tpu.memory_space<smem>>
    %9 = vector.broadcast %8 : f32 to vector<256x8xf32>
    %10 = arith.mulf %6, %9 : vector<256x8xf32>
    %c0_6 = arith.constant 0 : index
    %c0_7 = arith.constant 0 : index
    %c0_8 = arith.constant 0 : index
    %11 = vector.load %arg6[%c0_6, %c0_7, %c0_8] : memref<1x256x8xf32, #tpu.memory_space<vmem>>, vector<1x256x8xf32>
    %12 = vector.shape_cast %11 : vector<1x256x8xf32> to vector<256x8xf32>
    %13 = vector.shape_cast %10 : vector<256x8xf32> to vector<1x256x8xf32>
    tpu.vector_store %arg6[%c0_6, %c0_7, %c0_8], %13 {strides = array<i32>} : memref<1x256x8xf32, #tpu.memory_space<vmem>>, vector<1x256x8xf32>,
    return
  }
  func.func @transform_0(%arg0: i32, %arg1: i32, %arg2: memref<4xf32, #tpu.memory_space<smem>>) -> (i32, i32, i32) {
    %c0_i32 = arith.constant 0 : i32
    %c0_i32_0 = arith.constant 0 : i32
    return %arg0, %arg1, %c0_i32 : i32, i32, i32
  }
  func.func @transform_1(%arg0: i32, %arg1: i32, %arg2: memref<4xf32, #tpu.memory_space<smem>>) -> (i32, i32) {
    %c0_i32 = arith.constant 0 : i32
    %c0_i32_0 = arith.constant 0 : i32
    %c0_i32_1 = arith.constant 0 : i32
    return %c0_i32, %c0_i32_0 : i32, i32
  }
  func.func @transform_2(%arg0: i32, %arg1: i32, %arg2: memref<4xf32, #tpu.memory_space<smem>>) -> (i32, i32) {
    %c0_i32 = arith.constant 0 : i32
    %c0_i32_0 = arith.constant 0 : i32
    %c0_i32_1 = arith.constant 0 : i32
    return %c0_i32, %c0_i32_0 : i32, i32
  }
  func.func @transform_3(%arg0: i32, %arg1: i32, %arg2: memref<4xf32, #tpu.memory_space<smem>>) -> (i32, i32, i32) {
    %c0_i32 = arith.constant 0 : i32
    %c0_i32_0 = arith.constant 0 : i32
    return %arg0, %arg1, %c0_i32 : i32, i32, i32
  }
}

module attributes {stable_mosaic.version = 11 : i64} {
  func.func @bn_stats_kernel(%arg0: i32, %arg1: memref<64x128xf32, #tpu.memory_space<vmem>>, %arg2: memref<1x128xf32, #tpu.memory_space<vmem>>, %arg3: memref<1x128xf32, #tpu.memory_space<vmem>>) attributes {dimension_semantics = [#tpu.dimension_semantics<arbitrary>], iteration_bounds = array<i64: 2>, scalar_prefetch = 0 : i64, scratch_operands = 0 : i64, tpu.core_type = #tpu.core_type<tc>, window_params = [{transform_indices = @transform_0, window_bounds = array<i64: 64, 128>}, {pipeline_mode = #tpu.pipeline_mode<synchronous>, transform_indices = @transform_1, window_bounds = array<i64: 1, 128>}, {pipeline_mode = #tpu.pipeline_mode<synchronous>, transform_indices = @transform_2, window_bounds = array<i64: 1, 128>}]} {
    %c0_i32 = arith.constant 0 : i32
    %0 = arith.cmpi eq, %arg0, %c0_i32 : i32
    %1 = arith.extui %0 : i1 to i32
    %c0_i32_0 = arith.constant 0 : i32
    %2 = arith.cmpi ne, %1, %c0_i32_0 : i32
    scf.if %2 {
      %cst_11 = arith.constant 0.000000e+00 : f32
      %15 = vector.broadcast %cst_11 : f32 to vector<1x128xf32>
      %c0_12 = arith.constant 0 : index
      %c0_13 = arith.constant 0 : index
      %16 = vector.load %arg2[%c0_12, %c0_13] : memref<1x128xf32, #tpu.memory_space<vmem>>, vector<1x128xf32>
      tpu.vector_store %arg2[%c0_12, %c0_13], %15 {strides = array<i32>} : memref<1x128xf32, #tpu.memory_space<vmem>>, vector<1x128xf32>,
      %cst_14 = arith.constant 0.000000e+00 : f32
      %17 = vector.broadcast %cst_14 : f32 to vector<1x128xf32>
      %c0_15 = arith.constant 0 : index
      %c0_16 = arith.constant 0 : index
      %18 = vector.load %arg3[%c0_15, %c0_16] : memref<1x128xf32, #tpu.memory_space<vmem>>, vector<1x128xf32>
      tpu.vector_store %arg3[%c0_15, %c0_16], %17 {strides = array<i32>} : memref<1x128xf32, #tpu.memory_space<vmem>>, vector<1x128xf32>,
    } else {
    }
    %c0 = arith.constant 0 : index
    %c0_1 = arith.constant 0 : index
    %3 = vector.load %arg1[%c0, %c0_1] : memref<64x128xf32, #tpu.memory_space<vmem>>, vector<64x128xf32>
    %c0_2 = arith.constant 0 : index
    %c0_3 = arith.constant 0 : index
    %4 = vector.load %arg2[%c0_2, %c0_3] : memref<1x128xf32, #tpu.memory_space<vmem>>, vector<1x128xf32>
    %cst = arith.constant dense<0.000000e+00> : vector<128xf32>
    %5 = vector.multi_reduction <add>, %3, %cst [0] : vector<64x128xf32> to vector<128xf32>
    %6 = vector.shape_cast %5 : vector<128xf32> to vector<1x128xf32>
    %7 = arith.addf %4, %6 : vector<1x128xf32>
    %c0_4 = arith.constant 0 : index
    %c0_5 = arith.constant 0 : index
    %8 = vector.load %arg2[%c0_4, %c0_5] : memref<1x128xf32, #tpu.memory_space<vmem>>, vector<1x128xf32>
    tpu.vector_store %arg2[%c0_4, %c0_5], %7 {strides = array<i32>} : memref<1x128xf32, #tpu.memory_space<vmem>>, vector<1x128xf32>,
    %c0_6 = arith.constant 0 : index
    %c0_7 = arith.constant 0 : index
    %9 = vector.load %arg3[%c0_6, %c0_7] : memref<1x128xf32, #tpu.memory_space<vmem>>, vector<1x128xf32>
    %10 = arith.mulf %3, %3 : vector<64x128xf32>
    %cst_8 = arith.constant dense<0.000000e+00> : vector<128xf32>
    %11 = vector.multi_reduction <add>, %10, %cst_8 [0] : vector<64x128xf32> to vector<128xf32>
    %12 = vector.shape_cast %11 : vector<128xf32> to vector<1x128xf32>
    %13 = arith.addf %9, %12 : vector<1x128xf32>
    %c0_9 = arith.constant 0 : index
    %c0_10 = arith.constant 0 : index
    %14 = vector.load %arg3[%c0_9, %c0_10] : memref<1x128xf32, #tpu.memory_space<vmem>>, vector<1x128xf32>
    tpu.vector_store %arg3[%c0_9, %c0_10], %13 {strides = array<i32>} : memref<1x128xf32, #tpu.memory_space<vmem>>, vector<1x128xf32>,
    return
  }
  func.func @transform_0(%arg0: i32) -> (i32, i32) {
    %c0_i32 = arith.constant 0 : i32
    %c0_i32_0 = arith.constant 0 : i32
    return %arg0, %c0_i32 : i32, i32
  }
  func.func @transform_1(%arg0: i32) -> (i32, i32) {
    %c0_i32 = arith.constant 0 : i32
    %c0_i32_0 = arith.constant 0 : i32
    %c0_i32_1 = arith.constant 0 : i32
    return %c0_i32, %c0_i32_0 : i32, i32
  }
  func.func @transform_2(%arg0: i32) -> (i32, i32) {
    %c0_i32 = arith.constant 0 : i32
    %c0_i32_0 = arith.constant 0 : i32
    %c0_i32_1 = arith.constant 0 : i32
    return %c0_i32, %c0_i32_0 : i32, i32
  }
}

module attributes {stable_mosaic.version = 11 : i64} {
  func.func @bn_temb_if_kernel(%arg0: i32, %arg1: i32, %arg2: memref<4x1x16x128xf32, #tpu.memory_space<vmem>>, %arg3: memref<1x128xf32, #tpu.memory_space<vmem>>, %arg4: memref<1x128xf32, #tpu.memory_space<vmem>>, %arg5: memref<1x128xf32, #tpu.memory_space<vmem>>, %arg6: memref<1x128xf32, #tpu.memory_space<vmem>>, %arg7: memref<4x1x1x128xf32, #tpu.memory_space<vmem>>, %arg8: memref<4x1x16x128xbf16, #tpu.memory_space<vmem>>) attributes {dimension_semantics = [#tpu.dimension_semantics<parallel>, #tpu.dimension_semantics<parallel>], iteration_bounds = array<i64: 2, 1>, scalar_prefetch = 0 : i64, scratch_operands = 0 : i64, tpu.core_type = #tpu.core_type<tc>, window_params = [{transform_indices = @transform_0, window_bounds = array<i64: 4, 1, 16, 128>}, {pipeline_mode = #tpu.pipeline_mode<synchronous>, transform_indices = @transform_1, window_bounds = array<i64: 1, 128>}, {pipeline_mode = #tpu.pipeline_mode<synchronous>, transform_indices = @transform_2, window_bounds = array<i64: 1, 128>}, {pipeline_mode = #tpu.pipeline_mode<synchronous>, transform_indices = @transform_3, window_bounds = array<i64: 1, 128>}, {pipeline_mode = #tpu.pipeline_mode<synchronous>, transform_indices = @transform_4, window_bounds = array<i64: 1, 128>}, {transform_indices = @transform_5, window_bounds = array<i64: 4, 1, 1, 128>}, {transform_indices = @transform_6, window_bounds = array<i64: 4, 1, 16, 128>}]} {
    %c0 = arith.constant 0 : index
    %c0_0 = arith.constant 0 : index
    %0 = vector.load %arg5[%c0, %c0_0] : memref<1x128xf32, #tpu.memory_space<vmem>>, vector<1x128xf32>
    %c0_1 = arith.constant 0 : index
    %c0_2 = arith.constant 0 : index
    %1 = vector.load %arg4[%c0_1, %c0_2] : memref<1x128xf32, #tpu.memory_space<vmem>>, vector<1x128xf32>
    %cst = arith.constant 9.99999974E-6 : f32
    %2 = vector.broadcast %cst : f32 to vector<1x128xf32>
    %3 = arith.addf %1, %2 : vector<1x128xf32>
    %4 = math.rsqrt %3 : vector<1x128xf32>
    %5 = arith.mulf %0, %4 : vector<1x128xf32>
    %c0_3 = arith.constant 0 : index
    %c0_4 = arith.constant 0 : index
    %6 = vector.load %arg6[%c0_3, %c0_4] : memref<1x128xf32, #tpu.memory_space<vmem>>, vector<1x128xf32>
    %c0_5 = arith.constant 0 : index
    %c0_6 = arith.constant 0 : index
    %7 = vector.load %arg3[%c0_5, %c0_6] : memref<1x128xf32, #tpu.memory_space<vmem>>, vector<1x128xf32>
    %8 = arith.mulf %7, %5 : vector<1x128xf32>
    %9 = arith.subf %6, %8 : vector<1x128xf32>
    %cst_7 = arith.constant 0.000000e+00 : f32
    %10 = vector.broadcast %cst_7 : f32 to vector<16x128xf32>
    %c0_8 = arith.constant 0 : index
    %c0_9 = arith.constant 0 : index
    %c0_10 = arith.constant 0 : index
    %c0_11 = arith.constant 0 : index
    %11 = vector.load %arg2[%c0_8, %c0_9, %c0_10, %c0_11] : memref<4x1x16x128xf32, #tpu.memory_space<vmem>>, vector<1x1x16x128xf32>
    %12 = vector.shape_cast %11 : vector<1x1x16x128xf32> to vector<16x128xf32>
    %13 = vector.broadcast %5 : vector<1x128xf32> to vector<16x128xf32>
    %14 = arith.mulf %12, %13 : vector<16x128xf32>
    %15 = vector.broadcast %9 : vector<1x128xf32> to vector<16x128xf32>
    %16 = arith.addf %14, %15 : vector<16x128xf32>
    %c0_12 = arith.constant 0 : index
    %c0_13 = arith.constant 0 : index
    %c0_14 = arith.constant 0 : index
    %c0_15 = arith.constant 0 : index
    %17 = vector.load %arg7[%c0_12, %c0_13, %c0_14, %c0_15] : memref<4x1x1x128xf32, #tpu.memory_space<vmem>>, vector<1x1x1x128xf32>
    %18 = vector.shape_cast %17 : vector<1x1x1x128xf32> to vector<1x128xf32>
    %19 = vector.broadcast %18 : vector<1x128xf32> to vector<16x128xf32>
    %20 = arith.addf %16, %19 : vector<16x128xf32>
    %21 = arith.addf %10, %20 : vector<16x128xf32>
    %cst_16 = arith.constant 1.000000e+00 : f32
    %22 = vector.broadcast %cst_16 : f32 to vector<16x128xf32>
    %23 = arith.cmpf oge, %21, %22 : vector<16x128xf32>
    %24 = arith.extui %23 : vector<16x128xi1> to vector<16x128xi32>
    %25 = arith.sitofp %24 : vector<16x128xi32> to vector<16x128xf32>
    %26 = arith.truncf %25 : vector<16x128xf32> to vector<16x128xbf16>
    %c0_17 = arith.constant 0 : index
    %c0_18 = arith.constant 0 : index
    %c0_19 = arith.constant 0 : index
    %c0_20 = arith.constant 0 : index
    %27 = vector.load %arg8[%c0_17, %c0_18, %c0_19, %c0_20] : memref<4x1x16x128xbf16, #tpu.memory_space<vmem>>, vector<1x1x16x128xbf16>
    %28 = vector.shape_cast %27 : vector<1x1x16x128xbf16> to vector<16x128xbf16>
    %29 = vector.shape_cast %26 : vector<16x128xbf16> to vector<1x1x16x128xbf16>
    tpu.vector_store %arg8[%c0_17, %c0_18, %c0_19, %c0_20], %29 {strides = array<i32>} : memref<4x1x16x128xbf16, #tpu.memory_space<vmem>>, vector<1x1x16x128xbf16>,
    %cst_21 = arith.constant 1.000000e+00 : f32
    %30 = vector.broadcast %cst_21 : f32 to vector<16x128xf32>
    %31 = arith.subf %30, %25 : vector<16x128xf32>
    %32 = arith.mulf %21, %31 : vector<16x128xf32>
    %c1 = arith.constant 1 : index
    %c0_22 = arith.constant 0 : index
    %c0_23 = arith.constant 0 : index
    %c0_24 = arith.constant 0 : index
    %33 = vector.load %arg2[%c1, %c0_22, %c0_23, %c0_24] : memref<4x1x16x128xf32, #tpu.memory_space<vmem>>, vector<1x1x16x128xf32>
    %34 = vector.shape_cast %33 : vector<1x1x16x128xf32> to vector<16x128xf32>
    %35 = vector.broadcast %5 : vector<1x128xf32> to vector<16x128xf32>
    %36 = arith.mulf %34, %35 : vector<16x128xf32>
    %37 = vector.broadcast %9 : vector<1x128xf32> to vector<16x128xf32>
    %38 = arith.addf %36, %37 : vector<16x128xf32>
    %c1_25 = arith.constant 1 : index
    %c0_26 = arith.constant 0 : index
    %c0_27 = arith.constant 0 : index
    %c0_28 = arith.constant 0 : index
    %39 = vector.load %arg7[%c1_25, %c0_26, %c0_27, %c0_28] : memref<4x1x1x128xf32, #tpu.memory_space<vmem>>, vector<1x1x1x128xf32>
    %40 = vector.shape_cast %39 : vector<1x1x1x128xf32> to vector<1x128xf32>
    %41 = vector.broadcast %40 : vector<1x128xf32> to vector<16x128xf32>
    %42 = arith.addf %38, %41 : vector<16x128xf32>
    %43 = arith.addf %32, %42 : vector<16x128xf32>
    %cst_29 = arith.constant 1.000000e+00 : f32
    %44 = vector.broadcast %cst_29 : f32 to vector<16x128xf32>
    %45 = arith.cmpf oge, %43, %44 : vector<16x128xf32>
    %46 = arith.extui %45 : vector<16x128xi1> to vector<16x128xi32>
    %47 = arith.sitofp %46 : vector<16x128xi32> to vector<16x128xf32>
    %48 = arith.truncf %47 : vector<16x128xf32> to vector<16x128xbf16>
    %c1_30 = arith.constant 1 : index
    %c0_31 = arith.constant 0 : index
    %c0_32 = arith.constant 0 : index
    %c0_33 = arith.constant 0 : index
    %49 = vector.load %arg8[%c1_30, %c0_31, %c0_32, %c0_33] : memref<4x1x16x128xbf16, #tpu.memory_space<vmem>>, vector<1x1x16x128xbf16>
    %50 = vector.shape_cast %49 : vector<1x1x16x128xbf16> to vector<16x128xbf16>
    %51 = vector.shape_cast %48 : vector<16x128xbf16> to vector<1x1x16x128xbf16>
    tpu.vector_store %arg8[%c1_30, %c0_31, %c0_32, %c0_33], %51 {strides = array<i32>} : memref<4x1x16x128xbf16, #tpu.memory_space<vmem>>, vector<1x1x16x128xbf16>,
    %cst_34 = arith.constant 1.000000e+00 : f32
    %52 = vector.broadcast %cst_34 : f32 to vector<16x128xf32>
    %53 = arith.subf %52, %47 : vector<16x128xf32>
    %54 = arith.mulf %43, %53 : vector<16x128xf32>
    %c2 = arith.constant 2 : index
    %c0_35 = arith.constant 0 : index
    %c0_36 = arith.constant 0 : index
    %c0_37 = arith.constant 0 : index
    %55 = vector.load %arg2[%c2, %c0_35, %c0_36, %c0_37] : memref<4x1x16x128xf32, #tpu.memory_space<vmem>>, vector<1x1x16x128xf32>
    %56 = vector.shape_cast %55 : vector<1x1x16x128xf32> to vector<16x128xf32>
    %57 = vector.broadcast %5 : vector<1x128xf32> to vector<16x128xf32>
    %58 = arith.mulf %56, %57 : vector<16x128xf32>
    %59 = vector.broadcast %9 : vector<1x128xf32> to vector<16x128xf32>
    %60 = arith.addf %58, %59 : vector<16x128xf32>
    %c2_38 = arith.constant 2 : index
    %c0_39 = arith.constant 0 : index
    %c0_40 = arith.constant 0 : index
    %c0_41 = arith.constant 0 : index
    %61 = vector.load %arg7[%c2_38, %c0_39, %c0_40, %c0_41] : memref<4x1x1x128xf32, #tpu.memory_space<vmem>>, vector<1x1x1x128xf32>
    %62 = vector.shape_cast %61 : vector<1x1x1x128xf32> to vector<1x128xf32>
    %63 = vector.broadcast %62 : vector<1x128xf32> to vector<16x128xf32>
    %64 = arith.addf %60, %63 : vector<16x128xf32>
    %65 = arith.addf %54, %64 : vector<16x128xf32>
    %cst_42 = arith.constant 1.000000e+00 : f32
    %66 = vector.broadcast %cst_42 : f32 to vector<16x128xf32>
    %67 = arith.cmpf oge, %65, %66 : vector<16x128xf32>
    %68 = arith.extui %67 : vector<16x128xi1> to vector<16x128xi32>
    %69 = arith.sitofp %68 : vector<16x128xi32> to vector<16x128xf32>
    %70 = arith.truncf %69 : vector<16x128xf32> to vector<16x128xbf16>
    %c2_43 = arith.constant 2 : index
    %c0_44 = arith.constant 0 : index
    %c0_45 = arith.constant 0 : index
    %c0_46 = arith.constant 0 : index
    %71 = vector.load %arg8[%c2_43, %c0_44, %c0_45, %c0_46] : memref<4x1x16x128xbf16, #tpu.memory_space<vmem>>, vector<1x1x16x128xbf16>
    %72 = vector.shape_cast %71 : vector<1x1x16x128xbf16> to vector<16x128xbf16>
    %73 = vector.shape_cast %70 : vector<16x128xbf16> to vector<1x1x16x128xbf16>
    tpu.vector_store %arg8[%c2_43, %c0_44, %c0_45, %c0_46], %73 {strides = array<i32>} : memref<4x1x16x128xbf16, #tpu.memory_space<vmem>>, vector<1x1x16x128xbf16>,
    %cst_47 = arith.constant 1.000000e+00 : f32
    %74 = vector.broadcast %cst_47 : f32 to vector<16x128xf32>
    %75 = arith.subf %74, %69 : vector<16x128xf32>
    %76 = arith.mulf %65, %75 : vector<16x128xf32>
    %c3 = arith.constant 3 : index
    %c0_48 = arith.constant 0 : index
    %c0_49 = arith.constant 0 : index
    %c0_50 = arith.constant 0 : index
    %77 = vector.load %arg2[%c3, %c0_48, %c0_49, %c0_50] : memref<4x1x16x128xf32, #tpu.memory_space<vmem>>, vector<1x1x16x128xf32>
    %78 = vector.shape_cast %77 : vector<1x1x16x128xf32> to vector<16x128xf32>
    %79 = vector.broadcast %5 : vector<1x128xf32> to vector<16x128xf32>
    %80 = arith.mulf %78, %79 : vector<16x128xf32>
    %81 = vector.broadcast %9 : vector<1x128xf32> to vector<16x128xf32>
    %82 = arith.addf %80, %81 : vector<16x128xf32>
    %c3_51 = arith.constant 3 : index
    %c0_52 = arith.constant 0 : index
    %c0_53 = arith.constant 0 : index
    %c0_54 = arith.constant 0 : index
    %83 = vector.load %arg7[%c3_51, %c0_52, %c0_53, %c0_54] : memref<4x1x1x128xf32, #tpu.memory_space<vmem>>, vector<1x1x1x128xf32>
    %84 = vector.shape_cast %83 : vector<1x1x1x128xf32> to vector<1x128xf32>
    %85 = vector.broadcast %84 : vector<1x128xf32> to vector<16x128xf32>
    %86 = arith.addf %82, %85 : vector<16x128xf32>
    %87 = arith.addf %76, %86 : vector<16x128xf32>
    %cst_55 = arith.constant 1.000000e+00 : f32
    %88 = vector.broadcast %cst_55 : f32 to vector<16x128xf32>
    %89 = arith.cmpf oge, %87, %88 : vector<16x128xf32>
    %90 = arith.extui %89 : vector<16x128xi1> to vector<16x128xi32>
    %91 = arith.sitofp %90 : vector<16x128xi32> to vector<16x128xf32>
    %92 = arith.truncf %91 : vector<16x128xf32> to vector<16x128xbf16>
    %c3_56 = arith.constant 3 : index
    %c0_57 = arith.constant 0 : index
    %c0_58 = arith.constant 0 : index
    %c0_59 = arith.constant 0 : index
    %93 = vector.load %arg8[%c3_56, %c0_57, %c0_58, %c0_59] : memref<4x1x16x128xbf16, #tpu.memory_space<vmem>>, vector<1x1x16x128xbf16>
    %94 = vector.shape_cast %93 : vector<1x1x16x128xbf16> to vector<16x128xbf16>
    %95 = vector.shape_cast %92 : vector<16x128xbf16> to vector<1x1x16x128xbf16>
    tpu.vector_store %arg8[%c3_56, %c0_57, %c0_58, %c0_59], %95 {strides = array<i32>} : memref<4x1x16x128xbf16, #tpu.memory_space<vmem>>, vector<1x1x16x128xbf16>,
    return
  }
  func.func @transform_0(%arg0: i32, %arg1: i32) -> (i32, i32, i32, i32) {
    %c0_i32 = arith.constant 0 : i32
    %c0_i32_0 = arith.constant 0 : i32
    %c0_i32_1 = arith.constant 0 : i32
    return %c0_i32, %arg0, %arg1, %c0_i32_0 : i32, i32, i32, i32
  }
  func.func @transform_1(%arg0: i32, %arg1: i32) -> (i32, i32) {
    %c0_i32 = arith.constant 0 : i32
    %c0_i32_0 = arith.constant 0 : i32
    %c0_i32_1 = arith.constant 0 : i32
    return %c0_i32, %c0_i32_0 : i32, i32
  }
  func.func @transform_2(%arg0: i32, %arg1: i32) -> (i32, i32) {
    %c0_i32 = arith.constant 0 : i32
    %c0_i32_0 = arith.constant 0 : i32
    %c0_i32_1 = arith.constant 0 : i32
    return %c0_i32, %c0_i32_0 : i32, i32
  }
  func.func @transform_3(%arg0: i32, %arg1: i32) -> (i32, i32) {
    %c0_i32 = arith.constant 0 : i32
    %c0_i32_0 = arith.constant 0 : i32
    %c0_i32_1 = arith.constant 0 : i32
    return %c0_i32, %c0_i32_0 : i32, i32
  }
  func.func @transform_4(%arg0: i32, %arg1: i32) -> (i32, i32) {
    %c0_i32 = arith.constant 0 : i32
    %c0_i32_0 = arith.constant 0 : i32
    %c0_i32_1 = arith.constant 0 : i32
    return %c0_i32, %c0_i32_0 : i32, i32
  }
  func.func @transform_5(%arg0: i32, %arg1: i32) -> (i32, i32, i32, i32) {
    %c0_i32 = arith.constant 0 : i32
    %c0_i32_0 = arith.constant 0 : i32
    %c0_i32_1 = arith.constant 0 : i32
    %c0_i32_2 = arith.constant 0 : i32
    return %c0_i32, %arg0, %c0_i32_0, %c0_i32_1 : i32, i32, i32, i32
  }
  func.func @transform_6(%arg0: i32, %arg1: i32) -> (i32, i32, i32, i32) {
    %c0_i32 = arith.constant 0 : i32
    %c0_i32_0 = arith.constant 0 : i32
    %c0_i32_1 = arith.constant 0 : i32
    return %c0_i32, %arg0, %arg1, %c0_i32_0 : i32, i32, i32, i32
  }
}

module attributes {stable_mosaic.version = 11 : i64} {
  func.func @matmul_tsm_kernel(%arg0: i32, %arg1: i32, %arg2: memref<4xf32, #tpu.memory_space<smem>>, %arg3: memref<1x256x72xbf16, #tpu.memory_space<vmem>>, %arg4: memref<72x8xbf16, #tpu.memory_space<vmem>>, %arg5: memref<1x8xf32, #tpu.memory_space<vmem>>, %arg6: memref<1x256x8xf32, #tpu.memory_space<vmem>>) attributes {dimension_semantics = [#tpu.dimension_semantics<parallel>, #tpu.dimension_semantics<parallel>], iteration_bounds = array<i64: 4, 2>, scalar_prefetch = 1 : i64, scratch_operands = 0 : i64, tpu.core_type = #tpu.core_type<tc>, window_params = [{transform_indices = @transform_0, window_bounds = array<i64: 1, 256, 72>}, {pipeline_mode = #tpu.pipeline_mode<synchronous>, transform_indices = @transform_1, window_bounds = array<i64: 72, 8>}, {pipeline_mode = #tpu.pipeline_mode<synchronous>, transform_indices = @transform_2, window_bounds = array<i64: 1, 8>}, {transform_indices = @transform_3, window_bounds = array<i64: 1, 256, 8>}]} {
    %c0 = arith.constant 0 : index
    %c0_0 = arith.constant 0 : index
    %c0_1 = arith.constant 0 : index
    %0 = vector.load %arg3[%c0, %c0_0, %c0_1] : memref<1x256x72xbf16, #tpu.memory_space<vmem>>, vector<1x256x72xbf16>
    %1 = vector.shape_cast %0 : vector<1x256x72xbf16> to vector<256x72xbf16>
    %c0_2 = arith.constant 0 : index
    %c0_3 = arith.constant 0 : index
    %2 = vector.load %arg4[%c0_2, %c0_3] : memref<72x8xbf16, #tpu.memory_space<vmem>>, vector<72x8xbf16>
    %cst = arith.constant dense<0.000000e+00> : vector<256x8xf32>
    %3 = tpu.matmul %1, %2, %cst {dimension_numbers = #tpu.dot_dimension_numbers<[1], [0], [0], [1], [0, 0, 1, 1], [], []>} : vector<256x72xbf16>, vector<72x8xbf16>, vector<256x8xf32> -> vector<256x8xf32>
    %c0_4 = arith.constant 0 : index
    %c0_5 = arith.constant 0 : index
    %4 = vector.load %arg5[%c0_4, %c0_5] : memref<1x8xf32, #tpu.memory_space<vmem>>, vector<1x8xf32>
    %5 = vector.broadcast %4 : vector<1x8xf32> to vector<256x8xf32>
    %6 = arith.addf %3, %5 : vector<256x8xf32>
    %7 = arith.index_cast %arg0 : i32 to index
    %8 = memref.load %arg2[%7] : memref<4xf32, #tpu.memory_space<smem>>
    %9 = vector.broadcast %8 : f32 to vector<256x8xf32>
    %10 = arith.mulf %6, %9 : vector<256x8xf32>
    %c0_6 = arith.constant 0 : index
    %c0_7 = arith.constant 0 : index
    %c0_8 = arith.constant 0 : index
    %11 = vector.load %arg6[%c0_6, %c0_7, %c0_8] : memref<1x256x8xf32, #tpu.memory_space<vmem>>, vector<1x256x8xf32>
    %12 = vector.shape_cast %11 : vector<1x256x8xf32> to vector<256x8xf32>
    %13 = vector.shape_cast %10 : vector<256x8xf32> to vector<1x256x8xf32>
    tpu.vector_store %arg6[%c0_6, %c0_7, %c0_8], %13 {strides = array<i32>} : memref<1x256x8xf32, #tpu.memory_space<vmem>>, vector<1x256x8xf32>,
    return
  }
  func.func @transform_0(%arg0: i32, %arg1: i32, %arg2: memref<4xf32, #tpu.memory_space<smem>>) -> (i32, i32, i32) {
    %c0_i32 = arith.constant 0 : i32
    %c0_i32_0 = arith.constant 0 : i32
    return %arg0, %arg1, %c0_i32 : i32, i32, i32
  }
  func.func @transform_1(%arg0: i32, %arg1: i32, %arg2: memref<4xf32, #tpu.memory_space<smem>>) -> (i32, i32) {
    %c0_i32 = arith.constant 0 : i32
    %c0_i32_0 = arith.constant 0 : i32
    %c0_i32_1 = arith.constant 0 : i32
    return %c0_i32, %c0_i32_0 : i32, i32
  }
  func.func @transform_2(%arg0: i32, %arg1: i32, %arg2: memref<4xf32, #tpu.memory_space<smem>>) -> (i32, i32) {
    %c0_i32 = arith.constant 0 : i32
    %c0_i32_0 = arith.constant 0 : i32
    %c0_i32_1 = arith.constant 0 : i32
    return %c0_i32, %c0_i32_0 : i32, i32
  }
  func.func @transform_3(%arg0: i32, %arg1: i32, %arg2: memref<4xf32, #tpu.memory_space<smem>>) -> (i32, i32, i32) {
    %c0_i32 = arith.constant 0 : i32
    %c0_i32_0 = arith.constant 0 : i32
    return %arg0, %arg1, %c0_i32 : i32, i32, i32
  }
}

module attributes {stable_mosaic.version = 11 : i64} {
  func.func @bn_norm_add_kernel(%arg0: i32, %arg1: memref<64x128xf32, #tpu.memory_space<vmem>>, %arg2: memref<1x128xf32, #tpu.memory_space<vmem>>, %arg3: memref<1x128xf32, #tpu.memory_space<vmem>>, %arg4: memref<1x128xf32, #tpu.memory_space<vmem>>, %arg5: memref<1x128xf32, #tpu.memory_space<vmem>>, %arg6: memref<64x128xf32, #tpu.memory_space<vmem>>, %arg7: memref<64x128xf32, #tpu.memory_space<vmem>>) attributes {dimension_semantics = [#tpu.dimension_semantics<parallel>], iteration_bounds = array<i64: 2>, scalar_prefetch = 0 : i64, scratch_operands = 0 : i64, tpu.core_type = #tpu.core_type<tc>, window_params = [{transform_indices = @transform_0, window_bounds = array<i64: 64, 128>}, {pipeline_mode = #tpu.pipeline_mode<synchronous>, transform_indices = @transform_1, window_bounds = array<i64: 1, 128>}, {pipeline_mode = #tpu.pipeline_mode<synchronous>, transform_indices = @transform_2, window_bounds = array<i64: 1, 128>}, {pipeline_mode = #tpu.pipeline_mode<synchronous>, transform_indices = @transform_3, window_bounds = array<i64: 1, 128>}, {pipeline_mode = #tpu.pipeline_mode<synchronous>, transform_indices = @transform_4, window_bounds = array<i64: 1, 128>}, {transform_indices = @transform_5, window_bounds = array<i64: 64, 128>}, {transform_indices = @transform_6, window_bounds = array<i64: 64, 128>}]} {
    %c0 = arith.constant 0 : index
    %c0_0 = arith.constant 0 : index
    %0 = vector.load %arg4[%c0, %c0_0] : memref<1x128xf32, #tpu.memory_space<vmem>>, vector<1x128xf32>
    %c0_1 = arith.constant 0 : index
    %c0_2 = arith.constant 0 : index
    %1 = vector.load %arg3[%c0_1, %c0_2] : memref<1x128xf32, #tpu.memory_space<vmem>>, vector<1x128xf32>
    %cst = arith.constant 9.99999974E-6 : f32
    %2 = vector.broadcast %cst : f32 to vector<1x128xf32>
    %3 = arith.addf %1, %2 : vector<1x128xf32>
    %4 = math.rsqrt %3 : vector<1x128xf32>
    %5 = arith.mulf %0, %4 : vector<1x128xf32>
    %c0_3 = arith.constant 0 : index
    %c0_4 = arith.constant 0 : index
    %6 = vector.load %arg5[%c0_3, %c0_4] : memref<1x128xf32, #tpu.memory_space<vmem>>, vector<1x128xf32>
    %c0_5 = arith.constant 0 : index
    %c0_6 = arith.constant 0 : index
    %7 = vector.load %arg2[%c0_5, %c0_6] : memref<1x128xf32, #tpu.memory_space<vmem>>, vector<1x128xf32>
    %8 = arith.mulf %7, %5 : vector<1x128xf32>
    %9 = arith.subf %6, %8 : vector<1x128xf32>
    %c0_7 = arith.constant 0 : index
    %c0_8 = arith.constant 0 : index
    %10 = vector.load %arg1[%c0_7, %c0_8] : memref<64x128xf32, #tpu.memory_space<vmem>>, vector<64x128xf32>
    %11 = vector.broadcast %5 : vector<1x128xf32> to vector<64x128xf32>
    %12 = arith.mulf %10, %11 : vector<64x128xf32>
    %13 = vector.broadcast %9 : vector<1x128xf32> to vector<64x128xf32>
    %14 = arith.addf %12, %13 : vector<64x128xf32>
    %c0_9 = arith.constant 0 : index
    %c0_10 = arith.constant 0 : index
    %15 = vector.load %arg6[%c0_9, %c0_10] : memref<64x128xf32, #tpu.memory_space<vmem>>, vector<64x128xf32>
    %16 = arith.addf %14, %15 : vector<64x128xf32>
    %c0_11 = arith.constant 0 : index
    %c0_12 = arith.constant 0 : index
    %17 = vector.load %arg7[%c0_11, %c0_12] : memref<64x128xf32, #tpu.memory_space<vmem>>, vector<64x128xf32>
    tpu.vector_store %arg7[%c0_11, %c0_12], %16 {strides = array<i32>} : memref<64x128xf32, #tpu.memory_space<vmem>>, vector<64x128xf32>,
    return
  }
  func.func @transform_0(%arg0: i32) -> (i32, i32) {
    %c0_i32 = arith.constant 0 : i32
    %c0_i32_0 = arith.constant 0 : i32
    return %arg0, %c0_i32 : i32, i32
  }
  func.func @transform_1(%arg0: i32) -> (i32, i32) {
    %c0_i32 = arith.constant 0 : i32
    %c0_i32_0 = arith.constant 0 : i32
    %c0_i32_1 = arith.constant 0 : i32
    return %c0_i32, %c0_i32_0 : i32, i32
  }
  func.func @transform_2(%arg0: i32) -> (i32, i32) {
    %c0_i32 = arith.constant 0 : i32
    %c0_i32_0 = arith.constant 0 : i32
    %c0_i32_1 = arith.constant 0 : i32
    return %c0_i32, %c0_i32_0 : i32, i32
  }
  func.func @transform_3(%arg0: i32) -> (i32, i32) {
    %c0_i32 = arith.constant 0 : i32
    %c0_i32_0 = arith.constant 0 : i32
    %c0_i32_1 = arith.constant 0 : i32
    return %c0_i32, %c0_i32_0 : i32, i32
  }
  func.func @transform_4(%arg0: i32) -> (i32, i32) {
    %c0_i32 = arith.constant 0 : i32
    %c0_i32_0 = arith.constant 0 : i32
    %c0_i32_1 = arith.constant 0 : i32
    return %c0_i32, %c0_i32_0 : i32, i32
  }
  func.func @transform_5(%arg0: i32) -> (i32, i32) {
    %c0_i32 = arith.constant 0 : i32
    %c0_i32_0 = arith.constant 0 : i32
    return %arg0, %c0_i32 : i32, i32
  }
  func.func @transform_6(%arg0: i32) -> (i32, i32) {
    %c0_i32 = arith.constant 0 : i32
    %c0_i32_0 = arith.constant 0 : i32
    return %arg0, %c0_i32 : i32, i32
  }
}

</mosaic_0001>

<bundles_post_ra>
// kernel: spk_resblock_forward.11
= control target key start
LH: loop header
LB: loop body
LE: loop exit
PB: predicated region body
PF: predicated region fallthrough
CT: control target
= control target key end

     0   :  { %s553_s0 = inlined_call_operand.vmem [shape: f32[4], index: 0, kind: input, shape index: {}]   ;;  %s554_s1 = inlined_call_operand.vmem [shape: f32[4,8,32], index: 1, kind: input, shape index: {}]   ;;  %s555_s2 = inlined_call_operand.vmem [shape: f32[32,8], index: 2, kind: input, shape index: {}]   ;;  %s556_s3 = inlined_call_operand.vmem [shape: f32[1,8], index: 3, kind: input, shape index: {}]   ;;  %s557_s4 = inlined_call_operand.vmem [shape: f32[4,8,8], index: 4, kind: output, shape index: {}]  }
   0x1   :  { %s9_s17 = sshll.u32 %s553_s0, 4  ;;  %s10_s17 = int_to_ptr.vmem [resolvable:$true] %s9_s17 }
   0x2   :  { %s430_s18 = scalar_lea.vmem %s10_s17, 16  ;;  %p435_p1 = scmp.lt.s32.totalorder %s10_s17, %s10_s17 }
   0x3   :  { %p431_p0 = scmp.ne.s32.totalorder %s10_s17, %s430_s18  ;;  %p436_p2 = scmp.lt.s32.totalorder %s430_s18, %s430_s18 }
   0x5   :  { %p437_p3 = por %p436_p2, %p435_p1 }
   0x7   :  { %p438_p4 = pnand %p437_p3, %p431_p0 }
   0x9   :  { %441 = shalt.err (!%p438_p4)  }
   0xa   :  { %s468_s19 = smov [#allocation3]  }
   0xb   :  { %12 = dma.vmem_to_smem %s10_s17, 16, %s468_s19, [#allocation2] }
   0xc   :  { %454 = dma.done.wait [#allocation2], 16 }
   0xd   :  { %455 = vsyncadd [#allocation2], 4294967280 }
   0xe   :  { %14 = sfence }
   0xf   :  { %s500_s20 = smov 0   ;;  %s502_s21 = smov 0  }
  0x10   :  { %s504_s22 = smov 0  }
  0x11 LB: > { %s32_s0 = sadd.s32 1, %s462_s21  ;;  %p373_p5 = scmp.ge.s32.totalorder %s466_s22, 1  ;;  %s466_s22 = sphi %s504_s22, %s20_s22   ;;  %s462_s21 = sphi %s502_s21, %s559_s21   ;;  %s458_s20 = sphi %s500_s20, %s558_s20  }
  0x12   : > { %p34_p6 = scmp.ge.s32.totalorder %s32_s0, 4  ;;  %p162_p7 = scmp.lt.s32.totalorder %s466_s22, 5 }
  0x14   : > { %s561_s0 = smov (%p34_p6, %s32_s0), 0  ;;  %p163_p8 = pnand %p373_p5, %p162_p7 }
  0x15   : > { %v205_v0 = vld [vmem:[%s555_s2] sm:$0xff] (!%p163_p8)  ;;  %v206_v1 = vld [vmem:[%s555_s2 + $0x8] sm:$0xff] (!%p163_p8)  ;;  %v207_v2 = vld [vmem:[%s555_s2 + $0x10] sm:$0xff] (!%p163_p8)  ;;  %v469_v3 = vmov (!%p163_p8), 0.0|0.0   ;;  %vm470_vm0 = vmmov (!%p163_p8), 0   ;;  %v471_v6 = vmov (!%p163_p8), 0.0  }
  0x16   : > { %166 = sbr.rel (%p163_p8) target bundleno = 251 (0xfb), region = 32  ;;  %396 = vmatprep.subr.bf16.mxu0 (!%p163_p8), %v469_v3  ;;  %v397_v4 = vpack.c.bf16 (!%p163_p8), %v206_v1, %v205_v0  ;;  %v208_v5 = vld [vmem:[%s555_s2 + $0x18] sm:$0xff] (!%p163_p8)  ;;  %393 = vmatprep.mubr.msk.f32.mxu0 (!%p163_p8), %vm470_vm0, %v471_v6  ;;  %p190_p9 = scmp.lt.s32.totalorder (!%p163_p8), %s458_s20, 3  ;;  %vm216_vm1 = vcmask (!%p163_p8), 261120   ;;  %v376_v9 = vld [vmem:[%s556_s3] ss:$0 sm:$0xff] (!%p163_p8) }
  0x17   : > { %v400_v7 = vpack.c.bf16 (!%p163_p8), %v208_v5, %v207_v2  ;;  %s290_s10 = sld [smem:[#allocation3 + %s458_s20]] (!%p163_p8)  ;;  %vm293_vm2 = vcmask (!%p163_p8), 64512  }
  0x18   : > { %398 = vmatpush3.bf16.msra.mxu0 (!%p163_p8), %v397_v4 }
  0x19   : > { %399 = vmatprep.subr.bf16.mxu0 (!%p163_p8), %v469_v3 }
  0x1c   : > { %401 = vmatpush3.bf16.msra.mxu0 (!%p163_p8), %v400_v7 }
  0x1d   : > { %s191_s5 = scalar_select %p190_p9, %s458_s20, 3  ;;  %v291_v11 = vstv %s290_s10 }
  0x1f   : > { %s374_s6 = sshll.u32 %s191_s5, 3 }
  0x20   : > { %s196_s9 = scalar_lea.vmem %s554_s1, %s374_s6  ;;  %s203_s15 = scalar_lea.vmem %s557_s4, %s374_s6 }
  0x21   : > { %v204_v8 = vld [vmem:[%s196_s9] sm:$0xff] }
  0x22   : > { %394 = vmatmul.mubr.msk.f32.vlgmr.msra.gmra.mrb[0].mxu0 %vm216_vm1, %v204_v8 }
  0xf5   : > { %v286_v10 = vpop.f32.mrb[0].mxu0 }
  0xf6   : > { %v287_v12 = vadd.f32 %v376_v9, %v286_v10  ;;  %v395_v13 = vpop.f32.mrb[1].mxu0 }
  0xf8   : > { %v292_v14 = vmul.f32 %v291_v11, %v287_v12 }
  0xfa   : > { %294 = vst.msk [vmem:[%s203_s15] sm:$0xff] %vm293_vm2, %v292_v14 }
  0xfb PF: > { %s20_s22 = sadd.s32 1, %s466_s22   ;;  %s558_s20 = smov %s462_s21 }
  0xfc   : > { %p17_p10 = scmp.ge.s32.totalorder %s20_s22, 6   ;;  %s559_s21 = smov %s561_s0 }
  0xfe   :  { %19 = sbr.rel (!%p17_p10) target bundleno = 17 (0x11), region = 62 }

// kernel: spk_resblock_forward.9
= control target key start
LH: loop header
LB: loop body
LE: loop exit
PB: predicated region body
PF: predicated region fallthrough
CT: control target
= control target key end

     0   :  { %v162_v2 = vmov 0.0   ;;  %s209_s0 = inlined_call_operand.vmem [shape: f32[4,16,128], index: 0, kind: input, shape index: {}]   ;;  %s210_s1 = inlined_call_operand.vmem [shape: bf16[4,16,128], index: 1, kind: output, shape index: {}]  }
   0x1   :  { %v8_v0 = vld [vmem:[%s209_s0] sm:$0xff]  ;;  %v9_v1 = vld [vmem:[%s209_s0 + $0x8] sm:$0xff]  ;;  %v114_v8 = vld [vmem:[%s209_s0 + $0x10] sm:$0xff] }
   0x2   :  { %vm12_vm0 = vcmp.ge.f32.partialorder %v8_v0, 1.0  ;;  %vm13_vm1 = vcmp.ge.f32.partialorder %v9_v1, 1.0  ;;  %v115_v9 = vld [vmem:[%s209_s0 + $0x18] sm:$0xff]  ;;  %v122_v19 = vld [vmem:[%s209_s0 + $0x20] sm:$0xff]  ;;  %v123_v20 = vld [vmem:[%s209_s0 + $0x28] sm:$0xff] }
   0x3   :  { %v110_v3 = vsel %vm12_vm0, 1.0, %v162_v2  ;;  %v111_v4 = vsel %vm13_vm1, 1.0, %v162_v2  ;;  %v130_v30 = vld [vmem:[%s209_s0 + $0x30] sm:$0xff]  ;;  %v131_v31 = vld [vmem:[%s209_s0 + $0x38] sm:$0xff] }
   0x4   :  { %v147_v5 = vpack.c.bf16 %v111_v4, %v110_v3  ;;  %v28_v6 = vsub.f32 1.0, %v110_v3  ;;  %v29_v7 = vsub.f32 1.0, %v111_v4 }
   0x6   :  { %148 = vst [vmem:[%s210_s1] sm:$0xff] %v147_v5   ;;  %v30_v10 = vmul.f32 %v28_v6, %v8_v0  ;;  %v31_v11 = vmul.f32 %v29_v7, %v9_v1 }
   0x8   :  { %v35_v12 = vadd.f32 %v114_v8, %v30_v10  ;;  %v36_v13 = vadd.f32 %v115_v9, %v31_v11 }
   0xa   :  { %vm37_vm2 = vcmp.ge.f32.partialorder %v35_v12, 1.0  ;;  %vm38_vm3 = vcmp.ge.f32.partialorder %v36_v13, 1.0 }
   0xb   :  { %v116_v14 = vsel %vm37_vm2, 1.0, %v162_v2  ;;  %v117_v15 = vsel %vm38_vm3, 1.0, %v162_v2 }
   0xc   :  { %v150_v16 = vpack.c.bf16 %v117_v15, %v116_v14  ;;  %v54_v17 = vsub.f32 1.0, %v116_v14  ;;  %v55_v18 = vsub.f32 1.0, %v117_v15 }
   0xe   :  { %158 = vst [vmem:[%s210_s1 + $0x8] sm:$0xff] %v150_v16   ;;  %v56_v21 = vmul.f32 %v54_v17, %v35_v12  ;;  %v57_v22 = vmul.f32 %v55_v18, %v36_v13 }
  0x10   :  { %v61_v23 = vadd.f32 %v122_v19, %v56_v21  ;;  %v62_v24 = vadd.f32 %v123_v20, %v57_v22 }
  0x12   :  { %vm63_vm4 = vcmp.ge.f32.partialorder %v61_v23, 1.0  ;;  %vm64_vm5 = vcmp.ge.f32.partialorder %v62_v24, 1.0 }
  0x13   :  { %v124_v25 = vsel %vm63_vm4, 1.0, %v162_v2  ;;  %v125_v26 = vsel %vm64_vm5, 1.0, %v162_v2 }
  0x14   :  { %v153_v27 = vpack.c.bf16 %v125_v26, %v124_v25  ;;  %v80_v28 = vsub.f32 1.0, %v124_v25  ;;  %v81_v29 = vsub.f32 1.0, %v125_v26 }
  0x16   :  { %159 = vst [vmem:[%s210_s1 + $0x10] sm:$0xff] %v153_v27   ;;  %v82_v32 = vmul.f32 %v80_v28, %v61_v23  ;;  %v83_v33 = vmul.f32 %v81_v29, %v62_v24 }
  0x18   :  { %v87_v34 = vadd.f32 %v130_v30, %v82_v32  ;;  %v88_v35 = vadd.f32 %v131_v31, %v83_v33 }
  0x1a   :  { %vm89_vm6 = vcmp.ge.f32.partialorder %v87_v34, 1.0  ;;  %vm90_vm7 = vcmp.ge.f32.partialorder %v88_v35, 1.0 }
  0x1b   :  { %v132_v36 = vsel %vm89_vm6, 1.0, %v162_v2  ;;  %v133_v37 = vsel %vm90_vm7, 1.0, %v162_v2 }
  0x1c   :  { %v156_v38 = vpack.c.bf16 %v133_v37, %v132_v36 }
  0x1e   :  { %160 = vst [vmem:[%s210_s1 + $0x18] sm:$0xff] %v156_v38  }

// kernel: spk_resblock_forward.15
= control target key start
LH: loop header
LB: loop body
LE: loop exit
PB: predicated region body
PF: predicated region fallthrough
CT: control target
= control target key end

     0   :  { %s1265_s0 = inlined_call_operand.vmem [shape: f32[4], index: 0, kind: input, shape index: {}]   ;;  %s1266_s1 = inlined_call_operand.vmem [shape: f32[4,512,4], index: 1, kind: input, shape index: {}]   ;;  %s1267_s2 = inlined_call_operand.vmem [shape: f32[4,8], index: 2, kind: input, shape index: {}]   ;;  %s1268_s3 = inlined_call_operand.vmem [shape: f32[1,8], index: 3, kind: input, shape index: {}]   ;;  %s1269_s4 = inlined_call_operand.vmem [shape: f32[4,512,8], index: 4, kind: output, shape index: {}]  }
   0x1   :  { %s9_s17 = sshll.u32 %s1265_s0, 4  ;;  %s10_s17 = int_to_ptr.vmem [resolvable:$true] %s9_s17 }
   0x2   :  { %s913_s18 = scalar_lea.vmem %s10_s17, 16  ;;  %p918_p1 = scmp.lt.s32.totalorder %s10_s17, %s10_s17 }
   0x3   :  { %p914_p0 = scmp.ne.s32.totalorder %s10_s17, %s913_s18  ;;  %p919_p2 = scmp.lt.s32.totalorder %s913_s18, %s913_s18 }
   0x5   :  { %p920_p3 = por %p919_p2, %p918_p1 }
   0x7   :  { %p921_p4 = pnand %p920_p3, %p914_p0 }
   0x9   :  { %924 = shalt.err (!%p921_p4)  }
   0xa   :  { %s967_s19 = smov [#allocation3]  }
   0xb   :  { %12 = dma.vmem_to_smem %s10_s17, 16, %s967_s19, [#allocation2] }
   0xc   :  { %945 = dma.done.wait [#allocation2], 16 }
   0xd   :  { %946 = vsyncadd [#allocation2], 4294967280 }
   0xe   :  { %14 = sfence }
   0xf   :  { %s996_s20 = smov 0   ;;  %s998_s21 = smov 0  }
  0x10   :  { %s1000_s22 = smov 0   ;;  %s1002_s0 = smov 0  }
  0x11   :  { %s1004_s23 = smov 0  }
  0x12 LB: > { %s29_s24 = sadd.s32 1, %s957_s22  ;;  %s32_s25 = sadd.s32 1, %s961_s0  ;;  %s965_s23 = sphi %s1004_s23, %s20_s23   ;;  %s961_s0 = sphi %s1002_s0, %s1273_s0   ;;  %s957_s22 = sphi %s1000_s22, %s1272_s22   ;;  %s953_s21 = sphi %s998_s21, %s1271_s21   ;;  %s949_s20 = sphi %s996_s20, %s1270_s20  }
  0x13   : > { %p30_p5 = scmp.ge.s32.totalorder %s29_s24, 2  ;;  %p744_p6 = scmp.ge.s32.totalorder %s965_s23, 1 }
  0x14   : > { %p165_p7 = scmp.lt.s32.totalorder %s965_s23, 9 }
  0x15   : > { %s1275_s24 = smov (%p30_p5, %s29_s24), 0  ;;  %s1277_s25 = smov (!%p30_p5, %s32_s25), %s961_s0 }
  0x16   : > { %p166_p8 = pnand %p744_p6, %p165_p7  ;;  %p34_p9 = scmp.ge.s32.totalorder %s1277_s25, 4 }
  0x17   : > { %v249_v0 = vld [vmem:[%s1267_s2] sm:$0xf] (!%p166_p8)  ;;  %vm354_vm0 = vcmask (!%p166_p8), 1043456   ;;  %s745_s28 = sshll.u32 (!%p166_p8), %s949_s20, 5  ;;  %p198_p10 = scmp.lt.s32.totalorder (!%p166_p8), %s953_s21, 3  ;;  %vm257_vm1 = vcmask (!%p166_p8), 31744  }
  0x18   : > { %s1279_s25 = smov (%p34_p9, %s1277_s25), 0  ;;  %169 = sbr.rel (%p166_p8) target bundleno = 286 (0x11e), region = 32 }
  0x19   : > { %820 = vmatprep.subr.msk.mxu0 (!%p166_p8), %vm354_vm0, %v249_v0  ;;  %870 = vmatprep.subr.msk.mxu1 (!%p166_p8), %vm354_vm0, %v249_v0  ;;  %p200_p11 = scmp.lt.s32.totalorder (!%p166_p8), %s745_s28, 63  ;;  %s583_s10 = sld [smem:[#allocation3 + %s953_s21]] (!%p166_p8)  ;;  %v1111_v33 = vld [vmem:[%s1268_s3] ss:$0 sm:$0xff] (!%p166_p8)  ;;  %vm617_vm2 = vcmask (!%p166_p8), 64512  }
  0x1a   : > { %821 = vmatpush3.msk.msra.mxu0 (!%p166_p8), %vm354_vm0, %v249_v0  ;;  %871 = vmatpush3.msk.msra.mxu1 (!%p166_p8), %vm354_vm0, %v249_v0 }
  0x1f   : > { %s199_s29 = scalar_select %p198_p10, %s953_s21, 3  ;;  %v1113_v35 = vstv %s583_s10 }
  0x20   : > { %s1281_s28 = smov (!%p200_p11, %s745_s28), 63 }
  0x21   : > { %s746_s30 = sshll.u32 %s199_s29, 6 }
  0x22   : > { %s1033_s5 = sadd.s32 %s746_s30, %s1281_s28 }
  0x23   : > { %s747_s6 = sshll.u32 %s1033_s5, 3 }
  0x24   : > { %s1041_s9 = scalar_lea.vmem %s1266_s1, %s747_s6  ;;  %s1122_s15 = scalar_lea.vmem %s1269_s4, %s747_s6 }
  0x25   : > { %v217_v1 = vld [vmem:[%s1041_s9] sm:$0xff]  ;;  %v218_v3 = vld [vmem:[%s1041_s9 + $0x8] sm:$0xff]  ;;  %v219_v5 = vld [vmem:[%s1041_s9 + $0x10] sm:$0xff] }
  0x26   : > { %v233_v2 = vld [vmem:[%s1041_s9 + $0x80] sm:$0xff]  ;;  %822 = vmatprep.mubr.msk.f32.mxu0 %vm257_vm1, %v217_v1  ;;  %v234_v4 = vld [vmem:[%s1041_s9 + $0x88] sm:$0xff]  ;;  %v235_v6 = vld [vmem:[%s1041_s9 + $0x90] sm:$0xff] }
  0x27   : > { %846 = vmatprep.mubr.msk.f32.mxu1 %vm257_vm1, %v233_v2  ;;  %823 = vmatmul.mubr.msk.f32.vlgmr.msra.gmra.mrb[0].mxu0 %vm257_vm1, %v218_v3  ;;  %v220_v7 = vld [vmem:[%s1041_s9 + $0x18] sm:$0xff]  ;;  %v221_v9 = vld [vmem:[%s1041_s9 + $0x20] sm:$0xff]  ;;  %v222_v11 = vld [vmem:[%s1041_s9 + $0x28] sm:$0xff] }
  0x28   : > { %847 = vmatmul.mubr.msk.f32.vlgmr.msra.gmra.mrb[0].mxu1 %vm257_vm1, %v234_v4  ;;  %825 = vmatprep.mubr.msk.f32.mxu0 %vm257_vm1, %v219_v5  ;;  %v236_v8 = vld [vmem:[%s1041_s9 + $0x98] sm:$0xff]  ;;  %v237_v10 = vld [vmem:[%s1041_s9 + $0xa0] sm:$0xff]  ;;  %v238_v12 = vld [vmem:[%s1041_s9 + $0xa8] sm:$0xff] }
  0x29   : > { %849 = vmatprep.mubr.msk.f32.mxu1 %vm257_vm1, %v235_v6  ;;  %v223_v13 = vld [vmem:[%s1041_s9 + $0x30] sm:$0xff]  ;;  %v224_v15 = vld [vmem:[%s1041_s9 + $0x38] sm:$0xff]  ;;  %v225_v17 = vld [vmem:[%s1041_s9 + $0x40] sm:$0xff] }
  0x2a   : > { %v239_v14 = vld [vmem:[%s1041_s9 + $0xb0] sm:$0xff]  ;;  %v240_v16 = vld [vmem:[%s1041_s9 + $0xb8] sm:$0xff]  ;;  %v241_v18 = vld [vmem:[%s1041_s9 + $0xc0] sm:$0xff] }
  0x2b   : > { %826 = vmatmul.mubr.msk.f32.gmra.mrb[2].mxu0 %vm257_vm1, %v220_v7  ;;  %v226_v19 = vld [vmem:[%s1041_s9 + $0x48] sm:$0xff]  ;;  %v227_v21 = vld [vmem:[%s1041_s9 + $0x50] sm:$0xff]  ;;  %v228_v23 = vld [vmem:[%s1041_s9 + $0x58] sm:$0xff] }
  0x2c   : > { %850 = vmatmul.mubr.msk.f32.gmra.mrb[2].mxu1 %vm257_vm1, %v236_v8  ;;  %828 = vmatprep.mubr.msk.f32.mxu0 %vm257_vm1, %v221_v9  ;;  %v242_v20 = vld [vmem:[%s1041_s9 + $0xc8] sm:$0xff]  ;;  %v243_v22 = vld [vmem:[%s1041_s9 + $0xd0] sm:$0xff]  ;;  %v244_v24 = vld [vmem:[%s1041_s9 + $0xd8] sm:$0xff] }
  0x2d   : > { %852 = vmatprep.mubr.msk.f32.mxu1 %vm257_vm1, %v237_v10  ;;  %v229_v25 = vld [vmem:[%s1041_s9 + $0x60] sm:$0xff]  ;;  %v230_v27 = vld [vmem:[%s1041_s9 + $0x68] sm:$0xff]  ;;  %v231_v29 = vld [vmem:[%s1041_s9 + $0x70] sm:$0xff] }
  0x2e   : > { %v245_v26 = vld [vmem:[%s1041_s9 + $0xe0] sm:$0xff]  ;;  %v246_v28 = vld [vmem:[%s1041_s9 + $0xe8] sm:$0xff]  ;;  %v247_v30 = vld [vmem:[%s1041_s9 + $0xf0] sm:$0xff] }
  0x2f   : > { %829 = vmatmul.mubr.msk.f32.gmra.mrb[4].mxu0 %vm257_vm1, %v222_v11  ;;  %v232_v31 = vld [vmem:[%s1041_s9 + $0x78] sm:$0xff] }
  0x30   : > { %853 = vmatmul.mubr.msk.f32.gmra.mrb[4].mxu1 %vm257_vm1, %v238_v12  ;;  %831 = vmatprep.mubr.msk.f32.mxu0 %vm257_vm1, %v223_v13  ;;  %v248_v32 = vld [vmem:[%s1041_s9 + $0xf8] sm:$0xff] }
  0x31   : > { %855 = vmatprep.mubr.msk.f32.mxu1 %vm257_vm1, %v239_v14 }
  0x33   : > { %832 = vmatmul.mubr.msk.f32.gmra.mrb[6].mxu0 %vm257_vm1, %v224_v15 }
  0x34   : > { %856 = vmatmul.mubr.msk.f32.gmra.mrb[6].mxu1 %vm257_vm1, %v240_v16  ;;  %834 = vmatprep.mubr.msk.f32.mxu0 %vm257_vm1, %v225_v17 }
  0x35   : > { %858 = vmatprep.mubr.msk.f32.mxu1 %vm257_vm1, %v241_v18 }
  0x37   : > { %835 = vmatmul.mubr.msk.f32.gmra.mrb[8].mxu0 %vm257_vm1, %v226_v19 }
  0x38   : > { %859 = vmatmul.mubr.msk.f32.gmra.mrb[8].mxu1 %vm257_vm1, %v242_v20  ;;  %837 = vmatprep.mubr.msk.f32.mxu0 %vm257_vm1, %v227_v21 }
  0x39   : > { %861 = vmatprep.mubr.msk.f32.mxu1 %vm257_vm1, %v243_v22 }
  0x3b   : > { %838 = vmatmul.mubr.msk.f32.gmra.mrb[10].mxu0 %vm257_vm1, %v228_v23 }
  0x3c   : > { %862 = vmatmul.mubr.msk.f32.gmra.mrb[10].mxu1 %vm257_vm1, %v244_v24  ;;  %840 = vmatprep.mubr.msk.f32.mxu0 %vm257_vm1, %v229_v25 }
  0x3d   : > { %864 = vmatprep.mubr.msk.f32.mxu1 %vm257_vm1, %v245_v26 }
  0x3f   : > { %841 = vmatmul.mubr.msk.f32.gmra.mrb[12].mxu0 %vm257_vm1, %v230_v27 }
  0x40   : > { %865 = vmatmul.mubr.msk.f32.gmra.mrb[12].mxu1 %vm257_vm1, %v246_v28  ;;  %843 = vmatprep.mubr.msk.f32.mxu0 %vm257_vm1, %v231_v29 }
  0x41   : > { %867 = vmatprep.mubr.msk.f32.mxu1 %vm257_vm1, %v247_v30 }
  0x43   : > { %844 = vmatmul.mubr.msk.f32.gmra.mrb[14].mxu0 %vm257_vm1, %v232_v31 }
  0x44   : > { %868 = vmatmul.mubr.msk.f32.gmra.mrb[14].mxu1 %vm257_vm1, %v248_v32 }
  0xfa   : > { %v824_v34 = vpop.f32.mrb[0].mxu0 }
  0xfb   : > { %v848_v36 = vpop.f32.mrb[0].mxu1  ;;  %v430_v37 = vadd.f32 %v824_v34, %v1111_v33  ;;  %v424_v39 = vpop.f32.mrb[1].mxu0 }
  0xfc   : > { %v510_v38 = vadd.f32 %v848_v36, %v1111_v33  ;;  %v504_v40 = vpop.f32.mrb[1].mxu1  ;;  %v425_v41 = vadd.f32 %v1111_v33, %v424_v39 }
  0xfd   : > { %v505_v42 = vadd.f32 %v1111_v33, %v504_v40  ;;  %v586_v43 = vmul.f32 %v1113_v35, %v430_v37 }
  0xfe   : > { %v602_v44 = vmul.f32 %v1113_v35, %v510_v38  ;;  %v585_v45 = vmul.f32 %v1113_v35, %v425_v41  ;;  %v827_v47 = vpop.f32.mrb[2].mxu0 }
  0xff   : > { %v601_v46 = vmul.f32 %v1113_v35, %v505_v42  ;;  %v851_v48 = vpop.f32.mrb[2].mxu1  ;;  %619 = vst.msk [vmem:[%s1122_s15 + $0x8] sm:$0xff] %vm617_vm2, %v586_v43  ;;  %v440_v49 = vadd.f32 %v827_v47, %v1111_v33  ;;  %v434_v51 = vpop.f32.mrb[3].mxu0 }
 0x100   : > { %635 = vst.msk [vmem:[%s1122_s15 + $0x88] sm:$0xff] %vm617_vm2, %v602_v44  ;;  %v520_v50 = vadd.f32 %v851_v48, %v1111_v33  ;;  %v514_v52 = vpop.f32.mrb[3].mxu1  ;;  %618 = vst.msk [vmem:[%s1122_s15] sm:$0xff] %vm617_vm2, %v585_v45  ;;  %v435_v53 = vadd.f32 %v1111_v33, %v434_v51 }
 0x101   : > { %634 = vst.msk [vmem:[%s1122_s15 + $0x80] sm:$0xff] %vm617_vm2, %v601_v46  ;;  %v515_v54 = vadd.f32 %v1111_v33, %v514_v52  ;;  %v588_v55 = vmul.f32 %v1113_v35, %v440_v49 }
 0x102   : > { %v604_v56 = vmul.f32 %v1113_v35, %v520_v50  ;;  %v587_v57 = vmul.f32 %v1113_v35, %v435_v53  ;;  %v830_v59 = vpop.f32.mrb[4].mxu0 }
 0x103   : > { %v603_v58 = vmul.f32 %v1113_v35, %v515_v54  ;;  %v854_v60 = vpop.f32.mrb[4].mxu1  ;;  %621 = vst.msk [vmem:[%s1122_s15 + $0x18] sm:$0xff] %vm617_vm2, %v588_v55  ;;  %v450_v61 = vadd.f32 %v830_v59, %v1111_v33  ;;  %v444_v63 = vpop.f32.mrb[5].mxu0 }
 0x104   : > { %637 = vst.msk [vmem:[%s1122_s15 + $0x98] sm:$0xff] %vm617_vm2, %v604_v56  ;;  %v530_v62 = vadd.f32 %v854_v60, %v1111_v33  ;;  %v524_v0 = vpop.f32.mrb[5].mxu1  ;;  %620 = vst.msk [vmem:[%s1122_s15 + $0x10] sm:$0xff] %vm617_vm2, %v587_v57  ;;  %v445_v1 = vadd.f32 %v1111_v33, %v444_v63 }
 0x105   : > { %636 = vst.msk [vmem:[%s1122_s15 + $0x90] sm:$0xff] %vm617_vm2, %v603_v58  ;;  %v525_v2 = vadd.f32 %v1111_v33, %v524_v0  ;;  %v590_v3 = vmul.f32 %v1113_v35, %v450_v61 }
 0x106   : > { %v606_v4 = vmul.f32 %v1113_v35, %v530_v62  ;;  %v589_v5 = vmul.f32 %v1113_v35, %v445_v1  ;;  %v833_v7 = vpop.f32.mrb[6].mxu0 }
 0x107   : > { %v605_v6 = vmul.f32 %v1113_v35, %v525_v2  ;;  %v857_v8 = vpop.f32.mrb[6].mxu1  ;;  %623 = vst.msk [vmem:[%s1122_s15 + $0x28] sm:$0xff] %vm617_vm2, %v590_v3  ;;  %v460_v9 = vadd.f32 %v833_v7, %v1111_v33  ;;  %v454_v11 = vpop.f32.mrb[7].mxu0 }
 0x108   : > { %639 = vst.msk [vmem:[%s1122_s15 + $0xa8] sm:$0xff] %vm617_vm2, %v606_v4  ;;  %v540_v10 = vadd.f32 %v857_v8, %v1111_v33  ;;  %v534_v12 = vpop.f32.mrb[7].mxu1  ;;  %622 = vst.msk [vmem:[%s1122_s15 + $0x20] sm:$0xff] %vm617_vm2, %v589_v5  ;;  %v455_v13 = vadd.f32 %v1111_v33, %v454_v11 }
 0x109   : > { %638 = vst.msk [vmem:[%s1122_s15 + $0xa0] sm:$0xff] %vm617_vm2, %v605_v6  ;;  %v535_v14 = vadd.f32 %v1111_v33, %v534_v12  ;;  %v592_v15 = vmul.f32 %v1113_v35, %v460_v9 }
 0x10a   : > { %v608_v16 = vmul.f32 %v1113_v35, %v540_v10  ;;  %v591_v17 = vmul.f32 %v1113_v35, %v455_v13  ;;  %v836_v19 = vpop.f32.mrb[8].mxu0 }
 0x10b   : > { %v607_v18 = vmul.f32 %v1113_v35, %v535_v14  ;;  %v860_v20 = vpop.f32.mrb[8].mxu1  ;;  %625 = vst.msk [vmem:[%s1122_s15 + $0x38] sm:$0xff] %vm617_vm2, %v592_v15  ;;  %v470_v21 = vadd.f32 %v836_v19, %v1111_v33  ;;  %v464_v23 = vpop.f32.mrb[9].mxu0 }
 0x10c   : > { %641 = vst.msk [vmem:[%s1122_s15 + $0xb8] sm:$0xff] %vm617_vm2, %v608_v16  ;;  %v550_v22 = vadd.f32 %v860_v20, %v1111_v33  ;;  %v544_v24 = vpop.f32.mrb[9].mxu1  ;;  %624 = vst.msk [vmem:[%s1122_s15 + $0x30] sm:$0xff] %vm617_vm2, %v591_v17  ;;  %v465_v25 = vadd.f32 %v1111_v33, %v464_v23 }
 0x10d   : > { %640 = vst.msk [vmem:[%s1122_s15 + $0xb0] sm:$0xff] %vm617_vm2, %v607_v18  ;;  %v545_v26 = vadd.f32 %v1111_v33, %v544_v24  ;;  %v594_v27 = vmul.f32 %v1113_v35, %v470_v21 }
 0x10e   : > { %v610_v28 = vmul.f32 %v1113_v35, %v550_v22  ;;  %v593_v29 = vmul.f32 %v1113_v35, %v465_v25  ;;  %v839_v31 = vpop.f32.mrb[10].mxu0 }
 0x10f   : > { %v609_v30 = vmul.f32 %v1113_v35, %v545_v26  ;;  %v863_v32 = vpop.f32.mrb[10].mxu1  ;;  %627 = vst.msk [vmem:[%s1122_s15 + $0x48] sm:$0xff] %vm617_vm2, %v594_v27  ;;  %v480_v34 = vadd.f32 %v839_v31, %v1111_v33  ;;  %v474_v37 = vpop.f32.mrb[11].mxu0 }
 0x110   : > { %643 = vst.msk [vmem:[%s1122_s15 + $0xc8] sm:$0xff] %vm617_vm2, %v610_v28  ;;  %v560_v36 = vadd.f32 %v863_v32, %v1111_v33  ;;  %v554_v38 = vpop.f32.mrb[11].mxu1  ;;  %626 = vst.msk [vmem:[%s1122_s15 + $0x40] sm:$0xff] %vm617_vm2, %v593_v29  ;;  %v475_v39 = vadd.f32 %v1111_v33, %v474_v37 }
 0x111   : > { %642 = vst.msk [vmem:[%s1122_s15 + $0xc0] sm:$0xff] %vm617_vm2, %v609_v30  ;;  %v555_v40 = vadd.f32 %v1111_v33, %v554_v38  ;;  %v596_v41 = vmul.f32 %v1113_v35, %v480_v34 }
 0x112   : > { %v612_v42 = vmul.f32 %v1113_v35, %v560_v36  ;;  %v595_v43 = vmul.f32 %v1113_v35, %v475_v39  ;;  %v842_v45 = vpop.f32.mrb[12].mxu0 }
 0x113   : > { %v611_v44 = vmul.f32 %v1113_v35, %v555_v40  ;;  %v866_v46 = vpop.f32.mrb[12].mxu1  ;;  %629 = vst.msk [vmem:[%s1122_s15 + $0x58] sm:$0xff] %vm617_vm2, %v596_v41  ;;  %v490_v47 = vadd.f32 %v842_v45, %v1111_v33  ;;  %v484_v49 = vpop.f32.mrb[13].mxu0 }
 0x114   : > { %645 = vst.msk [vmem:[%s1122_s15 + $0xd8] sm:$0xff] %vm617_vm2, %v612_v42  ;;  %v570_v48 = vadd.f32 %v866_v46, %v1111_v33  ;;  %v564_v50 = vpop.f32.mrb[13].mxu1  ;;  %628 = vst.msk [vmem:[%s1122_s15 + $0x50] sm:$0xff] %vm617_vm2, %v595_v43  ;;  %v485_v51 = vadd.f32 %v1111_v33, %v484_v49 }
 0x115   : > { %644 = vst.msk [vmem:[%s1122_s15 + $0xd0] sm:$0xff] %vm617_vm2, %v611_v44  ;;  %v565_v52 = vadd.f32 %v1111_v33, %v564_v50  ;;  %v598_v53 = vmul.f32 %v1113_v35, %v490_v47 }
 0x116   : > { %v614_v54 = vmul.f32 %v1113_v35, %v570_v48  ;;  %v597_v55 = vmul.f32 %v1113_v35, %v485_v51  ;;  %v845_v57 = vpop.f32.mrb[14].mxu0 }
 0x117   : > { %v613_v56 = vmul.f32 %v1113_v35, %v565_v52  ;;  %v869_v58 = vpop.f32.mrb[14].mxu1  ;;  %631 = vst.msk [vmem:[%s1122_s15 + $0x68] sm:$0xff] %vm617_vm2, %v598_v53  ;;  %v500_v59 = vadd.f32 %v845_v57, %v1111_v33  ;;  %v494_v61 = vpop.f32.mrb[15].mxu0 }
 0x118   : > { %647 = vst.msk [vmem:[%s1122_s15 + $0xe8] sm:$0xff] %vm617_vm2, %v614_v54  ;;  %v580_v60 = vadd.f32 %v869_v58, %v1111_v33  ;;  %v574_v62 = vpop.f32.mrb[15].mxu1  ;;  %630 = vst.msk [vmem:[%s1122_s15 + $0x60] sm:$0xff] %vm617_vm2, %v597_v55  ;;  %v495_v63 = vadd.f32 %v1111_v33, %v494_v61 }
 0x119   : > { %646 = vst.msk [vmem:[%s1122_s15 + $0xe0] sm:$0xff] %vm617_vm2, %v613_v56  ;;  %v575_v0 = vadd.f32 %v1111_v33, %v574_v62  ;;  %v600_v1 = vmul.f32 %v1113_v35, %v500_v59 }
 0x11a   : > { %v616_v2 = vmul.f32 %v1113_v35, %v580_v60  ;;  %v599_v3 = vmul.f32 %v1113_v35, %v495_v63 }
 0x11b   : > { %v615_v4 = vmul.f32 %v1113_v35, %v575_v0  ;;  %633 = vst.msk [vmem:[%s1122_s15 + $0x78] sm:$0xff] %vm617_vm2, %v600_v1 }
 0x11c   : > { %649 = vst.msk [vmem:[%s1122_s15 + $0xf8] sm:$0xff] %vm617_vm2, %v616_v2  ;;  %632 = vst.msk [vmem:[%s1122_s15 + $0x70] sm:$0xff] %vm617_vm2, %v599_v3 }
 0x11d   : > { %648 = vst.msk [vmem:[%s1122_s15 + $0xf0] sm:$0xff] %vm617_vm2, %v615_v4 }
 0x11e PF: > { %s20_s23 = sadd.s32 1, %s965_s23   ;;  %s1270_s20 = smov %s957_s22 }
 0x11f   : > { %p17_p12 = scmp.ge.s32.totalorder %s20_s23, 10   ;;  %s1271_s21 = smov %s961_s0 }
 0x120   : > { %s1272_s22 = smov %s1275_s24  ;;  %s1273_s0 = smov %s1279_s25 }
 0x121   :  { %19 = sbr.rel (!%p17_p12) target bundleno = 18 (0x12), region = 62 }

// kernel: spk_resblock_forward.10
= control target key start
LH: loop header
LB: loop body
LE: loop exit
PB: predicated region body
PF: predicated region fallthrough
CT: control target
= control target key end

     0   :  { %s1228_s0 = inlined_call_operand.vmem [shape: f32[4], index: 0, kind: input, shape index: {}]   ;;  %s1229_s1 = inlined_call_operand.vmem [shape: bf16[4,512,36], index: 1, kind: input, shape index: {}]   ;;  %s1230_s2 = inlined_call_operand.vmem [shape: bf16[36,8], index: 2, kind: input, shape index: {}]   ;;  %s1231_s3 = inlined_call_operand.vmem [shape: f32[1,8], index: 3, kind: input, shape index: {}]   ;;  %s1232_s4 = inlined_call_operand.vmem [shape: f32[4,512,8], index: 4, kind: output, shape index: {}]  }
   0x1   :  { %s9_s17 = sshll.u32 %s1228_s0, 4  ;;  %s10_s17 = int_to_ptr.vmem [resolvable:$true] %s9_s17 }
   0x2   :  { %s902_s18 = scalar_lea.vmem %s10_s17, 16  ;;  %p907_p1 = scmp.lt.s32.totalorder %s10_s17, %s10_s17 }
   0x3   :  { %p903_p0 = scmp.ne.s32.totalorder %s10_s17, %s902_s18  ;;  %p908_p2 = scmp.lt.s32.totalorder %s902_s18, %s902_s18 }
   0x5   :  { %p909_p3 = por %p908_p2, %p907_p1 }
   0x7   :  { %p910_p4 = pnand %p909_p3, %p903_p0 }
   0x9   :  { %913 = shalt.err (!%p910_p4)  }
   0xa   :  { %s956_s19 = smov [#allocation3]  }
   0xb   :  { %12 = dma.vmem_to_smem %s10_s17, 16, %s956_s19, [#allocation2] }
   0xc   :  { %934 = dma.done.wait [#allocation2], 16 }
   0xd   :  { %935 = vsyncadd [#allocation2], 4294967280 }
   0xe   :  { %14 = sfence }
   0xf   :  { %s985_s20 = smov 0   ;;  %s987_s21 = smov 0  }
  0x10   :  { %s989_s22 = smov 0   ;;  %s991_s0 = smov 0  }
  0x11   :  { %s993_s23 = smov 0  }
  0x12 LB: > { %s29_s24 = sadd.s32 1, %s946_s22  ;;  %s32_s25 = sadd.s32 1, %s950_s0  ;;  %s954_s23 = sphi %s993_s23, %s20_s23   ;;  %s950_s0 = sphi %s991_s0, %s1236_s0   ;;  %s946_s22 = sphi %s989_s22, %s1235_s22   ;;  %s942_s21 = sphi %s987_s21, %s1234_s21   ;;  %s938_s20 = sphi %s985_s20, %s1233_s20  }
  0x13   : > { %p30_p5 = scmp.ge.s32.totalorder %s29_s24, 2  ;;  %p732_p6 = scmp.ge.s32.totalorder %s954_s23, 1 }
  0x14   : > { %p165_p7 = scmp.lt.s32.totalorder %s954_s23, 9 }
  0x15   : > { %s1238_s24 = smov (%p30_p5, %s29_s24), 0  ;;  %s1240_s25 = smov (!%p30_p5, %s32_s25), %s950_s0 }
  0x16   : > { %p166_p8 = pnand %p732_p6, %p165_p7  ;;  %p34_p9 = scmp.ge.s32.totalorder %s1240_s25, 4 }
  0x17   : > { %v883_v0 = vld [vmem:[%s1230_s2] sm:$0xff] (!%p166_p8)   ;;  %v884_v1 = vld [vmem:[%s1230_s2 + $0x8] sm:$0xff] (!%p166_p8)   ;;  %s733_s30 = sshll.u32 (!%p166_p8), %s938_s20, 5  ;;  %p198_p10 = scmp.lt.s32.totalorder (!%p166_p8), %s942_s21, 3  ;;  %vm406_vm0 = vcmask (!%p166_p8), 1041408   ;;  %vm357_vm1 = vcmask (!%p166_p8), 293888  }
  0x18   : > { %s1242_s25 = smov (%p34_p9, %s1240_s25), 0  ;;  %169 = sbr.rel (%p166_p8) target bundleno = 284 (0x11c), region = 32 }
  0x19   : > { %796 = vmatprep.subr.bf16.mxu0 (!%p166_p8), %v883_v0  ;;  %834 = vmatprep.subr.bf16.mxu1 (!%p166_p8), %v883_v0  ;;  %p200_p11 = scmp.lt.s32.totalorder (!%p166_p8), %s733_s30, 63  ;;  %v885_v2 = vld [vmem:[%s1230_s2 + $0x10] ss:$0 sps:$4 sm:$0x33] (!%p166_p8)   ;;  %s571_s14 = sld [smem:[#allocation3 + %s942_s21]] (!%p166_p8)  ;;  %vm605_vm2 = vcmask (!%p166_p8), 64512  }
  0x1a   : > { %797 = vmatpush3.bf16.msra.mxu0 (!%p166_p8), %v883_v0  ;;  %837 = vmatpush3.bf16.msra.mxu1 (!%p166_p8), %v883_v0  ;;  %v408_v3 = vsel (!%p166_p8), %vm406_vm0, %v885_v2, 0  ;;  %v1075_v20 = vld [vmem:[%s1231_s3] ss:$0 sm:$0xff] (!%p166_p8) }
  0x1b   : > { %798 = vmatprep.subr.bf16.mxu0 (!%p166_p8), %v884_v1  ;;  %835 = vmatprep.subr.bf16.mxu1 (!%p166_p8), %v884_v1 }
  0x1e   : > { %799 = vmatpush3.bf16.msra.mxu0 (!%p166_p8), %v884_v1  ;;  %838 = vmatpush3.bf16.msra.mxu1 (!%p166_p8), %v884_v1 }
  0x1f   : > { %s199_s7 = scalar_select %p198_p10, %s942_s21, 3  ;;  %840 = vmatprep.subr.msk.bf16.mxu0 %vm406_vm0, %v885_v2  ;;  %841 = vmatprep.subr.msk.bf16.mxu1 %vm406_vm0, %v885_v2  ;;  %v1078_v22 = vstv %s571_s14 }
  0x20   : > { %s1244_s30 = smov (!%p200_p11, %s733_s30), 63 }
  0x21   : > { %s734_s8 = sshll.u32 %s199_s7, 6 }
  0x22   : > { %s1031_s9 = sadd.s32 %s734_s8, %s1244_s30  ;;  %801 = vmatpush3.bf16.msra.mxu0 %v408_v3  ;;  %839 = vmatpush3.bf16.msra.mxu1 %v408_v3 }
  0x23   : > { %s735_s10 = sshll.u32 %s1031_s9, 2  ;;  %s738_s17 = sshll.u32 %s1031_s9, 3 }
  0x24   : > { %s1037_s13 = scalar_lea.vmem %s1229_s1, %s735_s10  ;;  %s1084_s20 = scalar_lea.vmem %s1232_s4, %s738_s17 }
  0x25   : > { %v886_v4 = vld [vmem:[%s1037_s13] sm:$0xff]   ;;  %v888_v6 = vld [vmem:[%s1037_s13 + $0x8] sm:$0xff]   ;;  %v890_v8 = vld [vmem:[%s1037_s13 + $0x10] sm:$0xff]  }
  0x26   : > { %v887_v5 = vld [vmem:[%s1037_s13 + $0x40] sm:$0xff]   ;;  %802 = vmatprep.mubr.msk.bf16.mxu0 %vm357_vm1, %v886_v4  ;;  %v889_v7 = vld [vmem:[%s1037_s13 + $0x48] sm:$0xff]   ;;  %v891_v9 = vld [vmem:[%s1037_s13 + $0x50] sm:$0xff]  }
  0x27   : > { %818 = vmatprep.mubr.msk.bf16.mxu1 %vm357_vm1, %v887_v5  ;;  %803 = vmatmul.mubr.msk.bf16.vlgmr.msra.gmra.mrb[0].mxu0 %vm357_vm1, %v888_v6  ;;  %v892_v10 = vld [vmem:[%s1037_s13 + $0x18] sm:$0xff]   ;;  %v894_v12 = vld [vmem:[%s1037_s13 + $0x20] sm:$0xff]   ;;  %v896_v14 = vld [vmem:[%s1037_s13 + $0x28] sm:$0xff]  }
  0x28   : > { %819 = vmatmul.mubr.msk.bf16.vlgmr.msra.gmra.mrb[0].mxu1 %vm357_vm1, %v889_v7  ;;  %806 = vmatprep.mubr.msk.bf16.mxu0 %vm357_vm1, %v890_v8  ;;  %v893_v11 = vld [vmem:[%s1037_s13 + $0x58] sm:$0xff]   ;;  %v895_v13 = vld [vmem:[%s1037_s13 + $0x60] sm:$0xff]   ;;  %v897_v15 = vld [vmem:[%s1037_s13 + $0x68] sm:$0xff]  }
  0x29   : > { %822 = vmatprep.mubr.msk.bf16.mxu1 %vm357_vm1, %v891_v9  ;;  %v898_v16 = vld [vmem:[%s1037_s13 + $0x30] sm:$0xff]   ;;  %v900_v18 = vld [vmem:[%s1037_s13 + $0x38] sm:$0xff]  }
  0x2a   : > { %v899_v17 = vld [vmem:[%s1037_s13 + $0x70] sm:$0xff]   ;;  %v901_v19 = vld [vmem:[%s1037_s13 + $0x78] sm:$0xff]  }
  0x2f   : > { %807 = vmatmul.mubr.msk.bf16.gmra.mrb[4].mxu0 %vm357_vm1, %v892_v10 }
  0x30   : > { %823 = vmatmul.mubr.msk.bf16.gmra.mrb[4].mxu1 %vm357_vm1, %v893_v11  ;;  %810 = vmatprep.mubr.msk.bf16.mxu0 %vm357_vm1, %v894_v12 }
  0x31   : > { %826 = vmatprep.mubr.msk.bf16.mxu1 %vm357_vm1, %v895_v13 }
  0x37   : > { %811 = vmatmul.mubr.msk.bf16.gmra.mrb[8].mxu0 %vm357_vm1, %v896_v14 }
  0x38   : > { %827 = vmatmul.mubr.msk.bf16.gmra.mrb[8].mxu1 %vm357_vm1, %v897_v15  ;;  %814 = vmatprep.mubr.msk.bf16.mxu0 %vm357_vm1, %v898_v16 }
  0x39   : > { %830 = vmatprep.mubr.msk.bf16.mxu1 %vm357_vm1, %v899_v17 }
  0x3f   : > { %815 = vmatmul.mubr.msk.bf16.gmra.mrb[12].mxu0 %vm357_vm1, %v900_v18 }
  0x40   : > { %831 = vmatmul.mubr.msk.bf16.gmra.mrb[12].mxu1 %vm357_vm1, %v901_v19 }
  0xfa   : > { %v804_v21 = vpop.f32.mrb[0].mxu0 }
  0xfb   : > { %v453_v23 = vadd.f32 %v804_v21, %v1075_v20  ;;  %v820_v24 = vpop.f32.mrb[0].mxu1  ;;  %v444_v25 = vpop.f32.mrb[1].mxu0 }
  0xfc   : > { %v517_v26 = vadd.f32 %v820_v24, %v1075_v20  ;;  %v445_v27 = vadd.f32 %v1075_v20, %v444_v25  ;;  %v508_v28 = vpop.f32.mrb[1].mxu1  ;;  %v805_v29 = vpop.f32.mrb[2].mxu0 }
  0xfd   : > { %v575_v30 = vmul.f32 %v1078_v22, %v453_v23  ;;  %v509_v31 = vadd.f32 %v1075_v20, %v508_v28  ;;  %v456_v32 = vadd.f32 %v805_v29, %v1075_v20  ;;  %v821_v33 = vpop.f32.mrb[2].mxu1  ;;  %v447_v34 = vpop.f32.mrb[3].mxu0 }
  0xfe   : > { %v591_v35 = vmul.f32 %v1078_v22, %v517_v26  ;;  %v573_v36 = vmul.f32 %v1078_v22, %v445_v27  ;;  %v520_v37 = vadd.f32 %v821_v33, %v1075_v20  ;;  %v448_v38 = vadd.f32 %v1075_v20, %v447_v34  ;;  %v511_v39 = vpop.f32.mrb[3].mxu1 }
  0xff   : > { %608 = vst.msk [vmem:[%s1084_s20 + $0x10] sm:$0xff] %vm605_vm2, %v575_v30  ;;  %v589_v40 = vmul.f32 %v1078_v22, %v509_v31  ;;  %v576_v41 = vmul.f32 %v1078_v22, %v456_v32  ;;  %v512_v42 = vadd.f32 %v1075_v20, %v511_v39 }
 0x100   : > { %624 = vst.msk [vmem:[%s1084_s20 + $0x90] sm:$0xff] %vm605_vm2, %v591_v35  ;;  %606 = vst.msk [vmem:[%s1084_s20] sm:$0xff] %vm605_vm2, %v573_v36  ;;  %v592_v43 = vmul.f32 %v1078_v22, %v520_v37  ;;  %v574_v44 = vmul.f32 %v1078_v22, %v448_v38 }
 0x101   : > { %622 = vst.msk [vmem:[%s1084_s20 + $0x80] sm:$0xff] %vm605_vm2, %v589_v40  ;;  %609 = vst.msk [vmem:[%s1084_s20 + $0x18] sm:$0xff] %vm605_vm2, %v576_v41  ;;  %v590_v45 = vmul.f32 %v1078_v22, %v512_v42 }
 0x102   : > { %625 = vst.msk [vmem:[%s1084_s20 + $0x98] sm:$0xff] %vm605_vm2, %v592_v43  ;;  %607 = vst.msk [vmem:[%s1084_s20 + $0x8] sm:$0xff] %vm605_vm2, %v574_v44  ;;  %v808_v46 = vpop.f32.mrb[4].mxu0 }
 0x103   : > { %623 = vst.msk [vmem:[%s1084_s20 + $0x88] sm:$0xff] %vm605_vm2, %v590_v45  ;;  %v469_v47 = vadd.f32 %v808_v46, %v1075_v20  ;;  %v824_v48 = vpop.f32.mrb[4].mxu1  ;;  %v460_v49 = vpop.f32.mrb[5].mxu0 }
 0x104   : > { %v533_v50 = vadd.f32 %v824_v48, %v1075_v20  ;;  %v461_v51 = vadd.f32 %v1075_v20, %v460_v49  ;;  %v524_v52 = vpop.f32.mrb[5].mxu1  ;;  %v809_v53 = vpop.f32.mrb[6].mxu0 }
 0x105   : > { %v579_v54 = vmul.f32 %v1078_v22, %v469_v47  ;;  %v525_v55 = vadd.f32 %v1075_v20, %v524_v52  ;;  %v472_v56 = vadd.f32 %v809_v53, %v1075_v20  ;;  %v825_v57 = vpop.f32.mrb[6].mxu1  ;;  %v463_v58 = vpop.f32.mrb[7].mxu0 }
 0x106   : > { %v595_v59 = vmul.f32 %v1078_v22, %v533_v50  ;;  %v577_v60 = vmul.f32 %v1078_v22, %v461_v51  ;;  %v536_v61 = vadd.f32 %v825_v57, %v1075_v20  ;;  %v464_v62 = vadd.f32 %v1075_v20, %v463_v58  ;;  %v527_v63 = vpop.f32.mrb[7].mxu1 }
 0x107   : > { %612 = vst.msk [vmem:[%s1084_s20 + $0x30] sm:$0xff] %vm605_vm2, %v579_v54  ;;  %v593_v0 = vmul.f32 %v1078_v22, %v525_v55  ;;  %v580_v1 = vmul.f32 %v1078_v22, %v472_v56  ;;  %v528_v2 = vadd.f32 %v1075_v20, %v527_v63 }
 0x108   : > { %628 = vst.msk [vmem:[%s1084_s20 + $0xb0] sm:$0xff] %vm605_vm2, %v595_v59  ;;  %610 = vst.msk [vmem:[%s1084_s20 + $0x20] sm:$0xff] %vm605_vm2, %v577_v60  ;;  %v596_v3 = vmul.f32 %v1078_v22, %v536_v61  ;;  %v578_v4 = vmul.f32 %v1078_v22, %v464_v62 }
 0x109   : > { %626 = vst.msk [vmem:[%s1084_s20 + $0xa0] sm:$0xff] %vm605_vm2, %v593_v0  ;;  %613 = vst.msk [vmem:[%s1084_s20 + $0x38] sm:$0xff] %vm605_vm2, %v580_v1  ;;  %v594_v5 = vmul.f32 %v1078_v22, %v528_v2 }
 0x10a   : > { %629 = vst.msk [vmem:[%s1084_s20 + $0xb8] sm:$0xff] %vm605_vm2, %v596_v3  ;;  %611 = vst.msk [vmem:[%s1084_s20 + $0x28] sm:$0xff] %vm605_vm2, %v578_v4  ;;  %v812_v6 = vpop.f32.mrb[8].mxu0 }
 0x10b   : > { %627 = vst.msk [vmem:[%s1084_s20 + $0xa8] sm:$0xff] %vm605_vm2, %v594_v5  ;;  %v485_v7 = vadd.f32 %v812_v6, %v1075_v20  ;;  %v828_v8 = vpop.f32.mrb[8].mxu1  ;;  %v476_v9 = vpop.f32.mrb[9].mxu0 }
 0x10c   : > { %v549_v10 = vadd.f32 %v828_v8, %v1075_v20  ;;  %v477_v11 = vadd.f32 %v1075_v20, %v476_v9  ;;  %v540_v12 = vpop.f32.mrb[9].mxu1  ;;  %v813_v13 = vpop.f32.mrb[10].mxu0 }
 0x10d   : > { %v583_v14 = vmul.f32 %v1078_v22, %v485_v7  ;;  %v541_v15 = vadd.f32 %v1075_v20, %v540_v12  ;;  %v488_v16 = vadd.f32 %v813_v13, %v1075_v20  ;;  %v829_v17 = vpop.f32.mrb[10].mxu1  ;;  %v479_v18 = vpop.f32.mrb[11].mxu0 }
 0x10e   : > { %v599_v19 = vmul.f32 %v1078_v22, %v549_v10  ;;  %v581_v21 = vmul.f32 %v1078_v22, %v477_v11  ;;  %v552_v23 = vadd.f32 %v829_v17, %v1075_v20  ;;  %v480_v24 = vadd.f32 %v1075_v20, %v479_v18  ;;  %v543_v25 = vpop.f32.mrb[11].mxu1 }
 0x10f   : > { %616 = vst.msk [vmem:[%s1084_s20 + $0x50] sm:$0xff] %vm605_vm2, %v583_v14  ;;  %v597_v26 = vmul.f32 %v1078_v22, %v541_v15  ;;  %v584_v27 = vmul.f32 %v1078_v22, %v488_v16  ;;  %v544_v28 = vadd.f32 %v1075_v20, %v543_v25 }
 0x110   : > { %632 = vst.msk [vmem:[%s1084_s20 + $0xd0] sm:$0xff] %vm605_vm2, %v599_v19  ;;  %614 = vst.msk [vmem:[%s1084_s20 + $0x40] sm:$0xff] %vm605_vm2, %v581_v21  ;;  %v600_v29 = vmul.f32 %v1078_v22, %v552_v23  ;;  %v582_v30 = vmul.f32 %v1078_v22, %v480_v24 }
 0x111   : > { %630 = vst.msk [vmem:[%s1084_s20 + $0xc0] sm:$0xff] %vm605_vm2, %v597_v26  ;;  %617 = vst.msk [vmem:[%s1084_s20 + $0x58] sm:$0xff] %vm605_vm2, %v584_v27  ;;  %v598_v31 = vmul.f32 %v1078_v22, %v544_v28 }
 0x112   : > { %633 = vst.msk [vmem:[%s1084_s20 + $0xd8] sm:$0xff] %vm605_vm2, %v600_v29  ;;  %615 = vst.msk [vmem:[%s1084_s20 + $0x48] sm:$0xff] %vm605_vm2, %v582_v30  ;;  %v816_v32 = vpop.f32.mrb[12].mxu0 }
 0x113   : > { %631 = vst.msk [vmem:[%s1084_s20 + $0xc8] sm:$0xff] %vm605_vm2, %v598_v31  ;;  %v501_v33 = vadd.f32 %v816_v32, %v1075_v20  ;;  %v832_v34 = vpop.f32.mrb[12].mxu1  ;;  %v492_v35 = vpop.f32.mrb[13].mxu0 }
 0x114   : > { %v565_v36 = vadd.f32 %v832_v34, %v1075_v20  ;;  %v493_v37 = vadd.f32 %v1075_v20, %v492_v35  ;;  %v556_v38 = vpop.f32.mrb[13].mxu1  ;;  %v817_v39 = vpop.f32.mrb[14].mxu0 }
 0x115   : > { %v587_v40 = vmul.f32 %v1078_v22, %v501_v33  ;;  %v557_v41 = vadd.f32 %v1075_v20, %v556_v38  ;;  %v504_v42 = vadd.f32 %v817_v39, %v1075_v20  ;;  %v833_v43 = vpop.f32.mrb[14].mxu1  ;;  %v495_v44 = vpop.f32.mrb[15].mxu0 }
 0x116   : > { %v603_v45 = vmul.f32 %v1078_v22, %v565_v36  ;;  %v585_v46 = vmul.f32 %v1078_v22, %v493_v37  ;;  %v568_v47 = vadd.f32 %v833_v43, %v1075_v20  ;;  %v496_v48 = vadd.f32 %v1075_v20, %v495_v44  ;;  %v559_v49 = vpop.f32.mrb[15].mxu1 }
 0x117   : > { %620 = vst.msk [vmem:[%s1084_s20 + $0x70] sm:$0xff] %vm605_vm2, %v587_v40  ;;  %v601_v50 = vmul.f32 %v1078_v22, %v557_v41  ;;  %v588_v51 = vmul.f32 %v1078_v22, %v504_v42  ;;  %v560_v52 = vadd.f32 %v1075_v20, %v559_v49 }
 0x118   : > { %636 = vst.msk [vmem:[%s1084_s20 + $0xf0] sm:$0xff] %vm605_vm2, %v603_v45  ;;  %618 = vst.msk [vmem:[%s1084_s20 + $0x60] sm:$0xff] %vm605_vm2, %v585_v46  ;;  %v604_v53 = vmul.f32 %v1078_v22, %v568_v47  ;;  %v586_v54 = vmul.f32 %v1078_v22, %v496_v48 }
 0x119   : > { %634 = vst.msk [vmem:[%s1084_s20 + $0xe0] sm:$0xff] %vm605_vm2, %v601_v50  ;;  %621 = vst.msk [vmem:[%s1084_s20 + $0x78] sm:$0xff] %vm605_vm2, %v588_v51  ;;  %v602_v55 = vmul.f32 %v1078_v22, %v560_v52 }
 0x11a   : > { %637 = vst.msk [vmem:[%s1084_s20 + $0xf8] sm:$0xff] %vm605_vm2, %v604_v53  ;;  %619 = vst.msk [vmem:[%s1084_s20 + $0x68] sm:$0xff] %vm605_vm2, %v586_v54 }
 0x11b   : > { %635 = vst.msk [vmem:[%s1084_s20 + $0xe8] sm:$0xff] %vm605_vm2, %v602_v55 }
 0x11c PF: > { %s20_s23 = sadd.s32 1, %s954_s23   ;;  %s1233_s20 = smov %s946_s22 }
 0x11d   : > { %p17_p12 = scmp.ge.s32.totalorder %s20_s23, 10   ;;  %s1234_s21 = smov %s950_s0 }
 0x11e   : > { %s1235_s22 = smov %s1238_s24  ;;  %s1236_s0 = smov %s1242_s25 }
 0x11f   :  { %19 = sbr.rel (!%p17_p12) target bundleno = 18 (0x12), region = 62 }

// kernel: spk_resblock_forward.12
= control target key start
LH: loop header
LB: loop body
LE: loop exit
PB: predicated region body
PF: predicated region fallthrough
CT: control target
= control target key end

     0   :  { %s259_s9 = smov 0   ;;  %s291_s0 = inlined_call_operand.vmem [shape: f32[128,128], index: 0, kind: input, shape index: {}]   ;;  %s292_s1 = inlined_call_operand.vmem [shape: f32[1,128], index: 1, kind: output, shape index: {0}]   ;;  %s293_s2 = inlined_call_operand.vmem [shape: f32[1,128], index: 2, kind: output, shape index: {1}]  }
   0x1 LB: > { %s217_s10 = sadd.s32 4294967295, %s241_s9   ;;  %p220_p0 = scmp.ge.s32.totalorder %s241_s9, 1  ;;  %s241_s9 = sphi %s259_s9, %s13_s9  }
   0x2   : > { %p106_p1 = scmp.lt.s32.totalorder %s241_s9, 3 }
   0x4   : > { %p107_p2 = pnand %p220_p0, %p106_p1 }
   0x5   : > { %s221_s11 = sshll.u32 (!%p107_p2), %s217_s10, 3  ;;  %p223_p4 = scmp.ne.s32.totalorder (!%p107_p2), %s217_s10, 0 }
   0x6   : > { %110 = sbr.rel (%p107_p2) target bundleno = 52 (0x34), region = 24  ;;  %p124_p3 = scmp.lt.s32.totalorder (!%p107_p2), %s221_s11, 15 }
   0xd   : > { %s295_s11 = smov (!%p124_p3, %s221_s11), 15  ;;  %132 = sbr.rel (%p223_p4) target bundleno = 20 (0x14), region = 28 }
   0xe   : > { %s222_s12 = sshll.u32 %s295_s11, 3  ;;  %v243_v0 = vmov (!%p223_p4), 0.0  }
   0xf   : > { %s127_s15 = scalar_lea.vmem %s291_s0, %s222_s12  ;;  %133 = vst [vmem:[%s292_s1] sm:$0x1] (!%p223_p4), %v243_v0  ;;  %134 = vst [vmem:[%s293_s2] sm:$0x1] (!%p223_p4), %v243_v0 }
  0x14 PF: > { %v135_v1 = vld [vmem:[%s127_s15] sm:$0xff]  ;;  %v136_v2 = vld [vmem:[%s127_s15 + $0x8] sm:$0xff]  ;;  %v137_v3 = vld [vmem:[%s127_s15 + $0x10] sm:$0xff] }
  0x15   : > { %v138_v4 = vld [vmem:[%s127_s15 + $0x18] sm:$0xff]  ;;  %v144_v5 = vadd.f32 %v136_v2, %v135_v1  ;;  %v160_v6 = vmul.f32 %v135_v1, %v135_v1  ;;  %v161_v7 = vmul.f32 %v136_v2, %v136_v2  ;;  %v162_v8 = vmul.f32 %v137_v3, %v137_v3  ;;  %v139_v9 = vld [vmem:[%s127_s15 + $0x20] sm:$0xff]  ;;  %v140_v13 = vld [vmem:[%s127_s15 + $0x28] sm:$0xff] }
  0x16   : > { %v163_v11 = vmul.f32 %v138_v4, %v138_v4  ;;  %v164_v15 = vmul.f32 %v139_v9, %v139_v9  ;;  %v141_v17 = vld [vmem:[%s127_s15 + $0x30] sm:$0xff]  ;;  %v165_v19 = vmul.f32 %v140_v13, %v140_v13  ;;  %v142_v21 = vld [vmem:[%s127_s15 + $0x38] sm:$0xff]  ;;  %v143_v40 = vld [vmem:[%s292_s1] sm:$0x1] }
  0x17   : > { %v145_v10 = vadd.f32 %v144_v5, %v137_v3  ;;  %v168_v12 = vadd.f32 %v161_v7, %v160_v6  ;;  %v166_v23 = vmul.f32 %v141_v17, %v141_v17  ;;  %v167_v26 = vmul.f32 %v142_v21, %v142_v21  ;;  %v159_v43 = vld [vmem:[%s293_s2] sm:$0x1] }
  0x19   : > { %v146_v14 = vadd.f32 %v145_v10, %v138_v4  ;;  %v169_v16 = vadd.f32 %v168_v12, %v162_v8 }
  0x1b   : > { %v147_v18 = vadd.f32 %v146_v14, %v139_v9  ;;  %v170_v20 = vadd.f32 %v169_v16, %v163_v11 }
  0x1d   : > { %v148_v22 = vadd.f32 %v147_v18, %v140_v13  ;;  %v171_v24 = vadd.f32 %v170_v20, %v164_v15 }
  0x1f   : > { %v149_v25 = vadd.f32 %v148_v22, %v141_v17  ;;  %v172_v27 = vadd.f32 %v171_v24, %v165_v19 }
  0x21   : > { %v150_v28 = vadd.f32 %v149_v25, %v142_v21  ;;  %v173_v29 = vadd.f32 %v172_v27, %v166_v23 }
  0x23   : > { %v151_v30 = vrot.slane %v150_v28, 4  ;;  %v174_v31 = vadd.f32 %v173_v29, %v167_v26 }
  0x25   : > { %v152_v32 = vadd.f32 %v151_v30, %v150_v28  ;;  %v175_v33 = vrot.slane %v174_v31, 4 }
  0x27   : > { %v153_v34 = vrot.slane %v152_v32, 2  ;;  %v176_v35 = vadd.f32 %v175_v33, %v174_v31 }
  0x29   : > { %v154_v36 = vadd.f32 %v153_v34, %v152_v32  ;;  %v177_v37 = vrot.slane %v176_v35, 2 }
  0x2b   : > { %v155_v38 = vrot.slane %v154_v36, 1  ;;  %v178_v39 = vadd.f32 %v177_v37, %v176_v35 }
  0x2d   : > { %v156_v41 = vadd.f32 %v155_v38, %v154_v36  ;;  %v179_v42 = vrot.slane %v178_v39, 1 }
  0x2f   : > { %v157_v44 = vadd.f32 %v156_v41, %v143_v40  ;;  %v180_v45 = vadd.f32 %v179_v42, %v178_v39 }
  0x31   : > { %158 = vst [vmem:[%s292_s1] sm:$0x1] %v157_v44  ;;  %v181_v46 = vadd.f32 %v180_v45, %v159_v43 }
  0x33   : > { %182 = vst [vmem:[%s293_s2] sm:$0x1] %v181_v46 }
  0x34 PF: > { %s13_s9 = sadd.s32 1, %s241_s9  }
  0x35   : > { %p10_p5 = scmp.ge.s32.totalorder %s13_s9, 4  }
  0x37   :  { %12 = sbr.rel (!%p10_p5) target bundleno = 1 (0x1), region = 62 }

// kernel: spk_resblock_forward.13
= control target key start
LH: loop header
LB: loop body
LE: loop exit
PB: predicated region body
PF: predicated region fallthrough
CT: control target
= control target key end

     0   :  { %s930_s21 = smov 0   ;;  %s932_s22 = smov 0   ;;  %s1058_s0 = inlined_call_operand.vmem [shape: f32[4,2,16,128], index: 0, kind: input, shape index: {}]   ;;  %s1059_s1 = inlined_call_operand.vmem [shape: f32[1,128], index: 1, kind: input, shape index: {}]   ;;  %s1060_s2 = inlined_call_operand.vmem [shape: f32[1,128], index: 2, kind: input, shape index: {}]   ;;  %s1061_s3 = inlined_call_operand.vmem [shape: f32[1,128], index: 3, kind: input, shape index: {}]   ;;  %s1062_s4 = inlined_call_operand.vmem [shape: f32[1,128], index: 4, kind: input, shape index: {}]   ;;  %s1063_s5 = inlined_call_operand.vmem [shape: f32[4,2,1,128], index: 5, kind: input, shape index: {}]   ;;  %s1064_s6 = inlined_call_operand.vmem [shape: bf16[4,2,16,128], index: 6, kind: output, shape index: {}]  }
   0x1   :  { %s934_s23 = smov 0   ;;  %s936_s24 = smov 0  }
   0x2   :  { %s938_s25 = smov 0  }
   0x3 LB: > { %s28_s26 = sadd.s32 1, %s888_s24  ;;  %s734_s27 = sadd.s32 4294967295, %s892_s25   ;;  %s892_s25 = sphi %s938_s25, %s16_s25   ;;  %s888_s24 = sphi %s936_s24, %s1070_s24   ;;  %s884_s23 = sphi %s934_s23, %s1069_s23   ;;  %s880_s22 = sphi %s932_s22, %s1068_s22   ;;  %s876_s21 = sphi %s930_s21, %s1067_s21  }
   0x4   : > { %p30_p0 = scmp.ge.s32.totalorder %s28_s26, 2  ;;  %p44_p1 = scmp.ne.s32.totalorder %s880_s22, %s876_s21 }
   0x5   : > { %p45_p2 = scmp.eq.s32.totalorder %s892_s25, 0  ;;  %p186_p4 = scmp.eq.s32.totalorder %s734_s27, 1 }
   0x6   : > { %s1072_s26 = smov (%p30_p0, %s28_s26), 0  ;;  %s37_s30 = sadd.s32 1, %s880_s22 }
   0x7   : > { %p962_p3 = por %p45_p2, %p44_p1  ;;  %s32_s29 = ssub.s32 %s888_s24, %s1072_s26 }
   0x8   : > { %p35_p5 = scmp.eq.s32.totalorder %s32_s29, 0  ;;  %p969_p6 = por %p186_p4, %p44_p1 }
   0x9   : > { %p737_p7 = scmp.ge.s32.totalorder %s892_s25, 2 }
   0xa   : > { %s974_s8 = scalar_select %p35_p5, %s880_s22, %s37_s30  }
   0xb   : > { %220 = sbr.rel (%p737_p7) target bundleno = 33 (0x21), region = 32 }
  0x12   : > { %223 = sbr.rel (!%p962_p3) target bundleno = 26 (0x1a), region = 36  ;;  %s225_s9 = sand.u32 (%p962_p3), 1, %s880_s22  }
  0x13   : > { %s786_s10 = sshll.u32 (%p962_p3), %s888_s24, 4  ;;  %s738_s11 = sshll.u32 (%p962_p3), %s225_s9, 6 }
  0x14   : > { %s232_s14 = scalar_lea.vmem (%p962_p3), %s1058_s0, %s786_s10  ;;  %s227_s15 = scalar_lea.vmem (%p962_p3), [#allocation2], %s738_s11 }
  0x15   : > { %v274_v0 = vld [vmem:[%s232_s14] sm:$0xff] (%p962_p3)  ;;  %v276_v1 = vld [vmem:[%s232_s14 + $0x8] sm:$0xff] (%p962_p3) }
  0x16   : > { %v278_v2 = vld [vmem:[%s232_s14 + $0x20] sm:$0xff] (%p962_p3)  ;;  %275 = vst [vmem:[%s227_s15] sm:$0xff] (%p962_p3), %v274_v0  ;;  %277 = vst [vmem:[%s227_s15 + $0x8] sm:$0xff] (%p962_p3), %v276_v1  ;;  %v280_v3 = vld [vmem:[%s232_s14 + $0x28] sm:$0xff] (%p962_p3) }
  0x17   : > { %279 = vst [vmem:[%s227_s15 + $0x10] sm:$0xff] (%p962_p3), %v278_v2  ;;  %v282_v4 = vld [vmem:[%s232_s14 + $0x40] sm:$0xff] (%p962_p3)  ;;  %v284_v5 = vld [vmem:[%s232_s14 + $0x48] sm:$0xff] (%p962_p3)  ;;  %281 = vst [vmem:[%s227_s15 + $0x18] sm:$0xff] (%p962_p3), %v280_v3 }
  0x18   : > { %283 = vst [vmem:[%s227_s15 + $0x20] sm:$0xff] (%p962_p3), %v282_v4  ;;  %285 = vst [vmem:[%s227_s15 + $0x28] sm:$0xff] (%p962_p3), %v284_v5  ;;  %v286_v6 = vld [vmem:[%s232_s14 + $0x60] sm:$0xff] (%p962_p3)  ;;  %v288_v7 = vld [vmem:[%s232_s14 + $0x68] sm:$0xff] (%p962_p3) }
  0x19   : > { %287 = vst [vmem:[%s227_s15 + $0x30] sm:$0xff] %v286_v6  ;;  %289 = vst [vmem:[%s227_s15 + $0x38] sm:$0xff] %v288_v7 }
  0x1a PF: > { %295 = sbr.rel (!%p962_p3) target bundleno = 33 (0x21), region = 74  ;;  %s297_s16 = sand.u32 (%p962_p3), 1, %s880_s22  }
  0x1b   : > { %s300_s19 = scalar_lea.vmem (%p962_p3), %s1063_s5, %s888_s24  ;;  %s741_s20 = sshll.u32 (%p962_p3), %s297_s16, 2 }
  0x1c   : > { %v316_v8 = vld [vmem:[%s300_s19] sm:$0x1] (%p962_p3)  ;;  %v318_v9 = vld [vmem:[%s300_s19 + $0x2] sm:$0x1] (%p962_p3)  ;;  %v320_v10 = vld [vmem:[%s300_s19 + $0x4] sm:$0x1] (%p962_p3) }
  0x1d   : > { %v322_v11 = vld [vmem:[%s300_s19 + $0x6] sm:$0x1] (%p962_p3)  ;;  %s299_s27 = scalar_lea.vmem (%p962_p3), [#allocation3], %s741_s20 }
  0x1e   : > { %317 = vst [vmem:[%s299_s27] sm:$0x1] (%p962_p3), %v316_v8  ;;  %319 = vst [vmem:[%s299_s27 + $0x1] sm:$0x1] (%p962_p3), %v318_v9 }
  0x1f   : > { %321 = vst [vmem:[%s299_s27 + $0x2] sm:$0x1] (%p962_p3), %v320_v10  ;;  %323 = vst [vmem:[%s299_s27 + $0x3] sm:$0x1] (%p962_p3), %v322_v11 }
  0x21 PF: > { %p742_p8 = scmp.ge.s32.totalorder %s892_s25, 1  ;;  %p345_p9 = scmp.lt.s32.totalorder %s892_s25, 3 }
  0x23   : > { %p346_p10 = pnand %p742_p8, %p345_p9 }
  0x24   : > { %v394_v12 = vld [vmem:[%s1060_s2] sm:$0x1] (!%p346_p10)  ;;  %v405_v14 = vlaneseq (!%p346_p10)  ;;  %s997_s30 = sand.u32 (!%p346_p10), 1, %s876_s21   ;;  %v894_v45 = vmov (!%p346_p10), 0.0  }
  0x25   : > { %349 = sbr.rel (%p346_p10) target bundleno = 99 (0x63), region = 108  ;;  %v395_v13 = vadd.f32 (!%p346_p10), 1e-05, %v394_v12  ;;  %s743_s9 = sshll.u32 (!%p346_p10), %s997_s30, 6  ;;  %v393_v16 = vld [vmem:[%s1061_s3] sm:$0x1] (!%p346_p10) }
  0x26   : > { %v406_v15 = vshrl.u32 (!%p346_p10), %v405_v14, 7  ;;  %v399_v19 = vld [vmem:[%s1059_s1] sm:$0x1] (!%p346_p10)  ;;  %s744_s14 = sshll.u32 (!%p346_p10), %s997_s30, 2  ;;  %s1010_s21 = scalar_lea.vmem (!%p346_p10), [#allocation2], %s743_s9 }
  0x27   : > { %852 = vrsqrt.f32 (!%p346_p10), %v395_v13  ;;  %v398_v21 = vld [vmem:[%s1062_s4] sm:$0x1] (!%p346_p10)  ;;  %v403_v23 = vld [vmem:[%s1010_s21 + $0x8] sm:$0xff] (!%p346_p10)  ;;  %v751_v26 = vld [vmem:[%s1010_s21 + $0x10] sm:$0xff] (!%p346_p10)  ;;  %s1016_s17 = scalar_lea.vmem (!%p346_p10), [#allocation3], %s744_s14  ;;  %s745_s18 = sshll.u32 (!%p346_p10), %s997_s30, 5 }
  0x28   : > { %v407_v17 = vsub.s32 (!%p346_p10), 0, %v406_v15  ;;  %v402_v22 = vld [vmem:[%s1010_s21] sm:$0xff] (!%p346_p10)  ;;  %v752_v27 = vld [vmem:[%s1010_s21 + $0x18] sm:$0xff] (!%p346_p10)  ;;  %v762_v43 = vld [vmem:[%s1010_s21 + $0x28] sm:$0xff] (!%p346_p10)  ;;  %s1023_s19 = scalar_lea.vmem (!%p346_p10), [#allocation4], %s745_s18 }
  0x29   : > { %v746_v34 = vld [vmem:[%s1016_s17] ss:$0 sm:$0xff] (!%p346_p10)  ;;  %v754_v42 = vld [vmem:[%s1016_s17 + $0x1] ss:$0 sm:$0xff] (!%p346_p10)  ;;  %v771_v57 = vld [vmem:[%s1010_s21 + $0x30] sm:$0xff] (!%p346_p10) }
  0x2a   : > { %v761_v38 = vld [vmem:[%s1010_s21 + $0x20] sm:$0xff] (!%p346_p10)  ;;  %v772_v62 = vld [vmem:[%s1010_s21 + $0x38] sm:$0xff] (!%p346_p10) }
  0x2b   : > { %v764_v61 = vld [vmem:[%s1016_s17 + $0x2] ss:$0 sm:$0xff] (!%p346_p10)  ;;  %v774_v14 = vld [vmem:[%s1016_s17 + $0x3] ss:$0 sm:$0xff] (!%p346_p10) }
  0x2c   : > { %s795_s20 = sshll.u32 (%p969_p6), %s884_s23, 3 }
  0x2d   : > { %s578_s29 = scalar_lea.vmem (%p969_p6), %s1064_s6, %s795_s20 }
  0x31   : > { %v853_v18 = vpop.eup %852 }
  0x32   : > { %v397_v20 = vmul.f32 %v853_v18, %v393_v16 }
  0x34   : > { %v400_v24 = vmul.f32 %v399_v19, %v397_v20  ;;  %v408_v25 = vrot.slane %v397_v20, %v407_v17 }
  0x36   : > { %v401_v28 = vsub.f32 %v398_v21, %v400_v24  ;;  %v410_v29 = vmul.f32 %v408_v25, %v402_v22  ;;  %v411_v30 = vmul.f32 %v408_v25, %v403_v23  ;;  %v454_v31 = vmul.f32 %v751_v26, %v408_v25 }
  0x37   : > { %v455_v33 = vmul.f32 %v752_v27, %v408_v25  ;;  %v494_v44 = vmul.f32 %v761_v38, %v408_v25  ;;  %v495_v49 = vmul.f32 %v762_v43, %v408_v25  ;;  %v534_v63 = vmul.f32 %v771_v57, %v408_v25 }
  0x38   : > { %v416_v32 = vrot.slane %v401_v28, %v407_v17  ;;  %v535_v3 = vmul.f32 %v772_v62, %v408_v25 }
  0x3a   : > { %v418_v35 = vadd.f32 %v416_v32, %v410_v29  ;;  %v419_v36 = vadd.f32 %v416_v32, %v411_v30  ;;  %v456_v37 = vadd.f32 %v454_v31, %v416_v32  ;;  %v457_v41 = vadd.f32 %v455_v33, %v416_v32 }
  0x3b   : > { %v496_v56 = vadd.f32 %v494_v44, %v416_v32  ;;  %v497_v60 = vadd.f32 %v495_v49, %v416_v32  ;;  %v536_v10 = vadd.f32 %v534_v63, %v416_v32  ;;  %v537_v13 = vadd.f32 %v535_v3, %v416_v32 }
  0x3c   : > { %v427_v39 = vadd.f32 %v746_v34, %v418_v35  ;;  %v428_v40 = vadd.f32 %v746_v34, %v419_v36  ;;  %v466_v48 = vadd.f32 %v754_v42, %v456_v37  ;;  %v467_v53 = vadd.f32 %v754_v42, %v457_v41 }
  0x3d   : > { %v506_v2 = vadd.f32 %v764_v61, %v496_v56  ;;  %v507_v7 = vadd.f32 %v764_v61, %v497_v60  ;;  %v546_v17 = vadd.f32 %v774_v14, %v536_v10  ;;  %v547_v21 = vadd.f32 %v774_v14, %v537_v13 }
  0x3e   : > { %vm431_vm0 = vcmp.ge.f32.partialorder %v427_v39, 1.0  ;;  %vm432_vm1 = vcmp.ge.f32.partialorder %v428_v40, 1.0 }
  0x3f   : > { %v747_v46 = vsel %vm431_vm0, 1.0, %v894_v45  ;;  %v748_v47 = vsel %vm432_vm1, 1.0, %v894_v45 }
  0x40   : > { %v797_v50 = vpack.c.bf16 %v748_v47, %v747_v46  ;;  %v447_v51 = vsub.f32 1.0, %v747_v46  ;;  %v448_v52 = vsub.f32 1.0, %v748_v47 }
  0x42   : > { %798 = vst [vmem:[%s1023_s19] sm:$0xff] %v797_v50   ;;  %v449_v54 = vmul.f32 %v447_v51, %v427_v39  ;;  %v450_v55 = vmul.f32 %v448_v52, %v428_v40 }
  0x44   : > { %v468_v58 = vadd.f32 %v466_v48, %v449_v54  ;;  %v469_v59 = vadd.f32 %v467_v53, %v450_v55 }
  0x46   : > { %vm470_vm2 = vcmp.ge.f32.partialorder %v468_v58, 1.0  ;;  %vm471_vm3 = vcmp.ge.f32.partialorder %v469_v59, 1.0 }
  0x47   : > { %v755_v0 = vsel %vm470_vm2, 1.0, %v894_v45  ;;  %v756_v1 = vsel %vm471_vm3, 1.0, %v894_v45 }
  0x48   : > { %v800_v4 = vpack.c.bf16 %v756_v1, %v755_v0  ;;  %v487_v5 = vsub.f32 1.0, %v755_v0  ;;  %v488_v6 = vsub.f32 1.0, %v756_v1 }
  0x49   : > { %v594_v29 = vld [vmem:[%s1023_s19] sm:$0xff] (%p969_p6)  }
  0x4a   : > { %808 = vst [vmem:[%s1023_s19 + $0x8] sm:$0xff] %v800_v4   ;;  %v489_v8 = vmul.f32 %v487_v5, %v468_v58  ;;  %v490_v9 = vmul.f32 %v488_v6, %v469_v59  ;;  %595 = vst [vmem:[%s578_s29] sm:$0xff] (%p969_p6), %v594_v29  }
  0x4c   : > { %v508_v11 = vadd.f32 %v506_v2, %v489_v8  ;;  %v509_v12 = vadd.f32 %v507_v7, %v490_v9 }
  0x4e   : > { %vm510_vm4 = vcmp.ge.f32.partialorder %v508_v11, 1.0  ;;  %vm511_vm5 = vcmp.ge.f32.partialorder %v509_v12, 1.0 }
  0x4f   : > { %v765_v15 = vsel %vm510_vm4, 1.0, %v894_v45  ;;  %v766_v16 = vsel %vm511_vm5, 1.0, %v894_v45 }
  0x50   : > { %v803_v18 = vpack.c.bf16 %v766_v16, %v765_v15  ;;  %v527_v19 = vsub.f32 1.0, %v765_v15  ;;  %v528_v20 = vsub.f32 1.0, %v766_v16 }
  0x51   : > { %v598_v30 = vld [vmem:[%s1023_s19 + $0x8] sm:$0xff] (%p969_p6)  }
  0x52   : > { %809 = vst [vmem:[%s1023_s19 + $0x10] sm:$0xff] %v803_v18   ;;  %v529_v22 = vmul.f32 %v527_v19, %v508_v11  ;;  %v530_v23 = vmul.f32 %v528_v20, %v509_v12  ;;  %599 = vst [vmem:[%s578_s29 + $0x10] sm:$0xff] (%p969_p6), %v598_v30  }
  0x54   : > { %v548_v24 = vadd.f32 %v546_v17, %v529_v22  ;;  %v549_v25 = vadd.f32 %v547_v21, %v530_v23  ;;  %573 = sbr.rel (!%p969_p6) target bundleno = 99 (0x63), region = 120 }
  0x56   : > { %vm550_vm6 = vcmp.ge.f32.partialorder %v548_v24, 1.0  ;;  %vm551_vm7 = vcmp.ge.f32.partialorder %v549_v25, 1.0 }
  0x57   : > { %v775_v26 = vsel %vm550_vm6, 1.0, %v894_v45  ;;  %v776_v27 = vsel %vm551_vm7, 1.0, %v894_v45 }
  0x58   : > { %v806_v28 = vpack.c.bf16 %v776_v27, %v775_v26 }
  0x59   : > { %v602_v31 = vld [vmem:[%s1023_s19 + $0x10] sm:$0xff] (%p969_p6)  }
  0x5a   : > { %810 = vst [vmem:[%s1023_s19 + $0x18] sm:$0xff] %v806_v28   ;;  %603 = vst [vmem:[%s578_s29 + $0x20] sm:$0xff] (%p969_p6), %v602_v31  }
  0x61   : > { %v606_v32 = vld [vmem:[%s1023_s19 + $0x18] sm:$0xff]  }
  0x62   : > { %607 = vst [vmem:[%s578_s29 + $0x30] sm:$0xff] %v606_v32  }
  0x63 PF: > { %s16_s25 = sadd.s32 1, %s892_s25   ;;  %s1067_s21 = smov %s880_s22 }
  0x64   : > { %p13_p11 = scmp.ge.s32.totalorder %s16_s25, 4   ;;  %s1068_s22 = smov %s974_s8 }
  0x65   : > { %s1069_s23 = smov %s888_s24  ;;  %s1070_s24 = smov %s1072_s26 }
  0x66   :  { %15 = sbr.rel (!%p13_p11) target bundleno = 3 (0x3), region = 209 }

// kernel: spk_resblock_forward.14
= control target key start
LH: loop header
LB: loop body
LE: loop exit
PB: predicated region body
PF: predicated region fallthrough
CT: control target
= control target key end

     0   :  { %s1264_s0 = inlined_call_operand.vmem [shape: f32[4], index: 0, kind: input, shape index: {}]   ;;  %s1265_s1 = inlined_call_operand.vmem [shape: bf16[4,512,72], index: 1, kind: input, shape index: {}]   ;;  %s1266_s2 = inlined_call_operand.vmem [shape: bf16[72,8], index: 2, kind: input, shape index: {}]   ;;  %s1267_s3 = inlined_call_operand.vmem [shape: f32[1,8], index: 3, kind: input, shape index: {}]   ;;  %s1268_s4 = inlined_call_operand.vmem [shape: f32[4,512,8], index: 4, kind: output, shape index: {}]  }
   0x1   :  { %s9_s17 = sshll.u32 %s1264_s0, 4  ;;  %s10_s17 = int_to_ptr.vmem [resolvable:$true] %s9_s17 }
   0x2   :  { %s932_s18 = scalar_lea.vmem %s10_s17, 16  ;;  %p937_p1 = scmp.lt.s32.totalorder %s10_s17, %s10_s17 }
   0x3   :  { %p933_p0 = scmp.ne.s32.totalorder %s10_s17, %s932_s18  ;;  %p938_p2 = scmp.lt.s32.totalorder %s932_s18, %s932_s18 }
   0x5   :  { %p939_p3 = por %p938_p2, %p937_p1 }
   0x7   :  { %p940_p4 = pnand %p939_p3, %p933_p0 }
   0x9   :  { %943 = shalt.err (!%p940_p4)  }
   0xa   :  { %s986_s19 = smov [#allocation3]  }
   0xb   :  { %12 = dma.vmem_to_smem %s10_s17, 16, %s986_s19, [#allocation2] }
   0xc   :  { %964 = dma.done.wait [#allocation2], 16 }
   0xd   :  { %965 = vsyncadd [#allocation2], 4294967280 }
   0xe   :  { %14 = sfence }
   0xf   :  { %s1015_s20 = smov 0   ;;  %s1017_s21 = smov 0  }
  0x10   :  { %s1019_s22 = smov 0   ;;  %s1021_s0 = smov 0  }
  0x11   :  { %s1023_s23 = smov 0  }
  0x12 LB: > { %s29_s24 = sadd.s32 1, %s976_s22  ;;  %s32_s25 = sadd.s32 1, %s980_s0  ;;  %s984_s23 = sphi %s1023_s23, %s20_s23   ;;  %s980_s0 = sphi %s1021_s0, %s1272_s0   ;;  %s976_s22 = sphi %s1019_s22, %s1271_s22   ;;  %s972_s21 = sphi %s1017_s21, %s1270_s21   ;;  %s968_s20 = sphi %s1015_s20, %s1269_s20  }
  0x13   : > { %p30_p5 = scmp.ge.s32.totalorder %s29_s24, 2  ;;  %p748_p6 = scmp.ge.s32.totalorder %s984_s23, 1 }
  0x14   : > { %p165_p7 = scmp.lt.s32.totalorder %s984_s23, 9 }
  0x15   : > { %s1274_s24 = smov (%p30_p5, %s29_s24), 0  ;;  %s1276_s25 = smov (!%p30_p5, %s32_s25), %s980_s0 }
  0x16   : > { %p166_p8 = pnand %p748_p6, %p165_p7  ;;  %p34_p9 = scmp.ge.s32.totalorder %s1276_s25, 4 }
  0x17   : > { %v911_v0 = vld [vmem:[%s1266_s2] sm:$0xff] (!%p166_p8)   ;;  %v912_v1 = vld [vmem:[%s1266_s2 + $0x8] sm:$0xff] (!%p166_p8)   ;;  %s749_s30 = sshll.u32 (!%p166_p8), %s968_s20, 5  ;;  %p198_p10 = scmp.lt.s32.totalorder (!%p166_p8), %s972_s21, 3  ;;  %v913_v2 = vld [vmem:[%s1266_s2 + $0x10] sm:$0xff] (!%p166_p8)   ;;  %vm373_vm0 = vcmask (!%p166_p8), 588800  }
  0x18   : > { %s1278_s25 = smov (%p34_p9, %s1276_s25), 0  ;;  %169 = sbr.rel (%p166_p8) target bundleno = 290 (0x122), region = 32 }
  0x19   : > { %816 = vmatprep.subr.bf16.mxu0 (!%p166_p8), %v911_v0  ;;  %858 = vmatprep.subr.bf16.mxu1 (!%p166_p8), %v911_v0  ;;  %p200_p11 = scmp.lt.s32.totalorder (!%p166_p8), %s749_s30, 63  ;;  %v914_v3 = vld [vmem:[%s1266_s2 + $0x18] sm:$0xff] (!%p166_p8)   ;;  %v915_v6 = vld [vmem:[%s1266_s2 + $0x20] ss:$0 sps:$4 sm:$0xff] (!%p166_p8)   ;;  %vm422_vm1 = vcmask (!%p166_p8), 1043456   ;;  %s587_s18 = sld [smem:[#allocation3 + %s972_s21]] (!%p166_p8) }
  0x1a   : > { %817 = vmatpush3.bf16.msra.mxu0 (!%p166_p8), %v911_v0  ;;  %863 = vmatpush3.bf16.msra.mxu1 (!%p166_p8), %v911_v0  ;;  %v424_v7 = vsel (!%p166_p8), %vm422_vm1, %v915_v6, 0  ;;  %v1111_v22 = vld [vmem:[%s1267_s3] ss:$0 sm:$0xff] (!%p166_p8)  ;;  %vm621_vm2 = vcmask (!%p166_p8), 64512  }
  0x1b   : > { %818 = vmatprep.subr.bf16.mxu0 (!%p166_p8), %v912_v1  ;;  %859 = vmatprep.subr.bf16.mxu1 (!%p166_p8), %v912_v1 }
  0x1e   : > { %819 = vmatpush3.bf16.msra.mxu0 (!%p166_p8), %v912_v1  ;;  %864 = vmatpush3.bf16.msra.mxu1 (!%p166_p8), %v912_v1 }
  0x1f   : > { %s199_s7 = scalar_select %p198_p10, %s972_s21, 3  ;;  %820 = vmatprep.subr.bf16.mxu0 %v913_v2  ;;  %860 = vmatprep.subr.bf16.mxu1 %v913_v2  ;;  %v1114_v24 = vstv %s587_s18 }
  0x20   : > { %s1280_s30 = smov (!%p200_p11, %s749_s30), 63 }
  0x21   : > { %s750_s8 = sshll.u32 %s199_s7, 6 }
  0x22   : > { %s1061_s9 = sadd.s32 %s750_s8, %s1280_s30  ;;  %821 = vmatpush3.bf16.msra.mxu0 %v913_v2  ;;  %865 = vmatpush3.bf16.msra.mxu1 %v913_v2 }
  0x23   : > { %s751_s12 = sshll.u32 %s1061_s9, 2  ;;  %822 = vmatprep.subr.bf16.mxu0 %v914_v3  ;;  %861 = vmatprep.subr.bf16.mxu1 %v914_v3  ;;  %s754_s26 = sshll.u32 %s1061_s9, 3 }
  0x24   : > { %s1070_s15 = scalar_lea.vmem %s1265_s1, %s751_s12  ;;  %s1121_s21 = scalar_lea.vmem %s1268_s4, %s754_s26 }
  0x25   : > { %v916_v4 = vld [vmem:[%s1070_s15] sm:$0xff]   ;;  %v918_v8 = vld [vmem:[%s1070_s15 + $0x8] sm:$0xff]   ;;  %v920_v10 = vld [vmem:[%s1070_s15 + $0x10] sm:$0xff]  }
  0x26   : > { %v917_v5 = vld [vmem:[%s1070_s15 + $0x40] sm:$0xff]   ;;  %826 = vmatprep.mubr.msk.bf16.mxu0 %vm373_vm0, %v916_v4  ;;  %823 = vmatpush3.bf16.msra.mxu0 %v914_v3  ;;  %v919_v9 = vld [vmem:[%s1070_s15 + $0x48] sm:$0xff]   ;;  %v921_v11 = vld [vmem:[%s1070_s15 + $0x50] sm:$0xff]  }
  0x27   : > { %842 = vmatprep.mubr.msk.bf16.mxu1 %vm373_vm0, %v917_v5  ;;  %866 = vmatpush3.bf16.msra.mxu1 %v914_v3  ;;  %v922_v12 = vld [vmem:[%s1070_s15 + $0x18] sm:$0xff]   ;;  %v924_v14 = vld [vmem:[%s1070_s15 + $0x20] sm:$0xff]   ;;  %v926_v16 = vld [vmem:[%s1070_s15 + $0x28] sm:$0xff]  }
  0x28   : > { %868 = vmatprep.subr.msk.bf16.mxu0 %vm422_vm1, %v915_v6  ;;  %869 = vmatprep.subr.msk.bf16.mxu1 %vm422_vm1, %v915_v6  ;;  %v923_v13 = vld [vmem:[%s1070_s15 + $0x58] sm:$0xff]   ;;  %v925_v15 = vld [vmem:[%s1070_s15 + $0x60] sm:$0xff]   ;;  %v927_v17 = vld [vmem:[%s1070_s15 + $0x68] sm:$0xff]  }
  0x29   : > { %v928_v18 = vld [vmem:[%s1070_s15 + $0x30] sm:$0xff]   ;;  %v930_v20 = vld [vmem:[%s1070_s15 + $0x38] sm:$0xff]  }
  0x2a   : > { %825 = vmatpush3.bf16.msra.mxu0 %v424_v7  ;;  %v929_v19 = vld [vmem:[%s1070_s15 + $0x70] sm:$0xff]   ;;  %v931_v21 = vld [vmem:[%s1070_s15 + $0x78] sm:$0xff]  }
  0x2b   : > { %867 = vmatpush3.bf16.msra.mxu1 %v424_v7 }
  0x2d   : > { %827 = vmatmul.mubr.msk.bf16.vlgmr.msra.gmra.mrb[0].mxu0 %vm373_vm0, %v918_v8 }
  0x2e   : > { %843 = vmatmul.mubr.msk.bf16.vlgmr.msra.gmra.mrb[0].mxu1 %vm373_vm0, %v919_v9  ;;  %830 = vmatprep.mubr.msk.bf16.mxu0 %vm373_vm0, %v920_v10 }
  0x2f   : > { %846 = vmatprep.mubr.msk.bf16.mxu1 %vm373_vm0, %v921_v11 }
  0x35   : > { %831 = vmatmul.mubr.msk.bf16.gmra.mrb[4].mxu0 %vm373_vm0, %v922_v12 }
  0x36   : > { %847 = vmatmul.mubr.msk.bf16.gmra.mrb[4].mxu1 %vm373_vm0, %v923_v13  ;;  %834 = vmatprep.mubr.msk.bf16.mxu0 %vm373_vm0, %v924_v14 }
  0x37   : > { %850 = vmatprep.mubr.msk.bf16.mxu1 %vm373_vm0, %v925_v15 }
  0x3d   : > { %835 = vmatmul.mubr.msk.bf16.gmra.mrb[8].mxu0 %vm373_vm0, %v926_v16 }
  0x3e   : > { %851 = vmatmul.mubr.msk.bf16.gmra.mrb[8].mxu1 %vm373_vm0, %v927_v17  ;;  %838 = vmatprep.mubr.msk.bf16.mxu0 %vm373_vm0, %v928_v18 }
  0x3f   : > { %854 = vmatprep.mubr.msk.bf16.mxu1 %vm373_vm0, %v929_v19 }
  0x45   : > { %839 = vmatmul.mubr.msk.bf16.gmra.mrb[12].mxu0 %vm373_vm0, %v930_v20 }
  0x46   : > { %855 = vmatmul.mubr.msk.bf16.gmra.mrb[12].mxu1 %vm373_vm0, %v931_v21 }
 0x100   : > { %v828_v23 = vpop.f32.mrb[0].mxu0 }
 0x101   : > { %v844_v25 = vpop.f32.mrb[0].mxu1  ;;  %v469_v26 = vadd.f32 %v828_v23, %v1111_v22  ;;  %v460_v28 = vpop.f32.mrb[1].mxu0 }
 0x102   : > { %v533_v27 = vadd.f32 %v844_v25, %v1111_v22  ;;  %v524_v29 = vpop.f32.mrb[1].mxu1  ;;  %v461_v30 = vadd.f32 %v1111_v22, %v460_v28  ;;  %v829_v32 = vpop.f32.mrb[2].mxu0 }
 0x103   : > { %v525_v31 = vadd.f32 %v1111_v22, %v524_v29  ;;  %v845_v33 = vpop.f32.mrb[2].mxu1  ;;  %v591_v34 = vmul.f32 %v1114_v24, %v469_v26  ;;  %v472_v36 = vadd.f32 %v829_v32, %v1111_v22  ;;  %v463_v38 = vpop.f32.mrb[3].mxu0 }
 0x104   : > { %v607_v35 = vmul.f32 %v1114_v24, %v533_v27  ;;  %v536_v37 = vadd.f32 %v845_v33, %v1111_v22  ;;  %v527_v39 = vpop.f32.mrb[3].mxu1  ;;  %v589_v40 = vmul.f32 %v1114_v24, %v461_v30  ;;  %v464_v42 = vadd.f32 %v1111_v22, %v463_v38 }
 0x105   : > { %v605_v41 = vmul.f32 %v1114_v24, %v525_v31  ;;  %v528_v43 = vadd.f32 %v1111_v22, %v527_v39  ;;  %624 = vst.msk [vmem:[%s1121_s21 + $0x10] sm:$0xff] %vm621_vm2, %v591_v34  ;;  %v592_v44 = vmul.f32 %v1114_v24, %v472_v36 }
 0x106   : > { %640 = vst.msk [vmem:[%s1121_s21 + $0x90] sm:$0xff] %vm621_vm2, %v607_v35  ;;  %v608_v45 = vmul.f32 %v1114_v24, %v536_v37  ;;  %622 = vst.msk [vmem:[%s1121_s21] sm:$0xff] %vm621_vm2, %v589_v40  ;;  %v590_v46 = vmul.f32 %v1114_v24, %v464_v42 }
 0x107   : > { %638 = vst.msk [vmem:[%s1121_s21 + $0x80] sm:$0xff] %vm621_vm2, %v605_v41  ;;  %v606_v47 = vmul.f32 %v1114_v24, %v528_v43  ;;  %625 = vst.msk [vmem:[%s1121_s21 + $0x18] sm:$0xff] %vm621_vm2, %v592_v44 }
 0x108   : > { %641 = vst.msk [vmem:[%s1121_s21 + $0x98] sm:$0xff] %vm621_vm2, %v608_v45  ;;  %623 = vst.msk [vmem:[%s1121_s21 + $0x8] sm:$0xff] %vm621_vm2, %v590_v46  ;;  %v832_v48 = vpop.f32.mrb[4].mxu0 }
 0x109   : > { %639 = vst.msk [vmem:[%s1121_s21 + $0x88] sm:$0xff] %vm621_vm2, %v606_v47  ;;  %v848_v49 = vpop.f32.mrb[4].mxu1  ;;  %v485_v50 = vadd.f32 %v832_v48, %v1111_v22  ;;  %v476_v52 = vpop.f32.mrb[5].mxu0 }
 0x10a   : > { %v549_v51 = vadd.f32 %v848_v49, %v1111_v22  ;;  %v540_v53 = vpop.f32.mrb[5].mxu1  ;;  %v477_v54 = vadd.f32 %v1111_v22, %v476_v52  ;;  %v833_v56 = vpop.f32.mrb[6].mxu0 }
 0x10b   : > { %v541_v55 = vadd.f32 %v1111_v22, %v540_v53  ;;  %v849_v57 = vpop.f32.mrb[6].mxu1  ;;  %v595_v58 = vmul.f32 %v1114_v24, %v485_v50  ;;  %v488_v60 = vadd.f32 %v833_v56, %v1111_v22  ;;  %v479_v62 = vpop.f32.mrb[7].mxu0 }
 0x10c   : > { %v611_v59 = vmul.f32 %v1114_v24, %v549_v51  ;;  %v552_v61 = vadd.f32 %v849_v57, %v1111_v22  ;;  %v543_v63 = vpop.f32.mrb[7].mxu1  ;;  %v593_v0 = vmul.f32 %v1114_v24, %v477_v54  ;;  %v480_v2 = vadd.f32 %v1111_v22, %v479_v62 }
 0x10d   : > { %v609_v1 = vmul.f32 %v1114_v24, %v541_v55  ;;  %v544_v3 = vadd.f32 %v1111_v22, %v543_v63  ;;  %628 = vst.msk [vmem:[%s1121_s21 + $0x30] sm:$0xff] %vm621_vm2, %v595_v58  ;;  %v596_v4 = vmul.f32 %v1114_v24, %v488_v60 }
 0x10e   : > { %644 = vst.msk [vmem:[%s1121_s21 + $0xb0] sm:$0xff] %vm621_vm2, %v611_v59  ;;  %v612_v5 = vmul.f32 %v1114_v24, %v552_v61  ;;  %626 = vst.msk [vmem:[%s1121_s21 + $0x20] sm:$0xff] %vm621_vm2, %v593_v0  ;;  %v594_v6 = vmul.f32 %v1114_v24, %v480_v2 }
 0x10f   : > { %642 = vst.msk [vmem:[%s1121_s21 + $0xa0] sm:$0xff] %vm621_vm2, %v609_v1  ;;  %v610_v7 = vmul.f32 %v1114_v24, %v544_v3  ;;  %629 = vst.msk [vmem:[%s1121_s21 + $0x38] sm:$0xff] %vm621_vm2, %v596_v4 }
 0x110   : > { %645 = vst.msk [vmem:[%s1121_s21 + $0xb8] sm:$0xff] %vm621_vm2, %v612_v5  ;;  %627 = vst.msk [vmem:[%s1121_s21 + $0x28] sm:$0xff] %vm621_vm2, %v594_v6  ;;  %v836_v8 = vpop.f32.mrb[8].mxu0 }
 0x111   : > { %643 = vst.msk [vmem:[%s1121_s21 + $0xa8] sm:$0xff] %vm621_vm2, %v610_v7  ;;  %v852_v9 = vpop.f32.mrb[8].mxu1  ;;  %v501_v10 = vadd.f32 %v836_v8, %v1111_v22  ;;  %v492_v12 = vpop.f32.mrb[9].mxu0 }
 0x112   : > { %v565_v11 = vadd.f32 %v852_v9, %v1111_v22  ;;  %v556_v13 = vpop.f32.mrb[9].mxu1  ;;  %v493_v14 = vadd.f32 %v1111_v22, %v492_v12  ;;  %v837_v16 = vpop.f32.mrb[10].mxu0 }
 0x113   : > { %v557_v15 = vadd.f32 %v1111_v22, %v556_v13  ;;  %v853_v17 = vpop.f32.mrb[10].mxu1  ;;  %v599_v18 = vmul.f32 %v1114_v24, %v501_v10  ;;  %v504_v20 = vadd.f32 %v837_v16, %v1111_v22  ;;  %v495_v23 = vpop.f32.mrb[11].mxu0 }
 0x114   : > { %v615_v19 = vmul.f32 %v1114_v24, %v565_v11  ;;  %v568_v21 = vadd.f32 %v853_v17, %v1111_v22  ;;  %v559_v25 = vpop.f32.mrb[11].mxu1  ;;  %v597_v26 = vmul.f32 %v1114_v24, %v493_v14  ;;  %v496_v28 = vadd.f32 %v1111_v22, %v495_v23 }
 0x115   : > { %v613_v27 = vmul.f32 %v1114_v24, %v557_v15  ;;  %v560_v29 = vadd.f32 %v1111_v22, %v559_v25  ;;  %632 = vst.msk [vmem:[%s1121_s21 + $0x50] sm:$0xff] %vm621_vm2, %v599_v18  ;;  %v600_v30 = vmul.f32 %v1114_v24, %v504_v20 }
 0x116   : > { %648 = vst.msk [vmem:[%s1121_s21 + $0xd0] sm:$0xff] %vm621_vm2, %v615_v19  ;;  %v616_v31 = vmul.f32 %v1114_v24, %v568_v21  ;;  %630 = vst.msk [vmem:[%s1121_s21 + $0x40] sm:$0xff] %vm621_vm2, %v597_v26  ;;  %v598_v32 = vmul.f32 %v1114_v24, %v496_v28 }
 0x117   : > { %646 = vst.msk [vmem:[%s1121_s21 + $0xc0] sm:$0xff] %vm621_vm2, %v613_v27  ;;  %v614_v33 = vmul.f32 %v1114_v24, %v560_v29  ;;  %633 = vst.msk [vmem:[%s1121_s21 + $0x58] sm:$0xff] %vm621_vm2, %v600_v30 }
 0x118   : > { %649 = vst.msk [vmem:[%s1121_s21 + $0xd8] sm:$0xff] %vm621_vm2, %v616_v31  ;;  %631 = vst.msk [vmem:[%s1121_s21 + $0x48] sm:$0xff] %vm621_vm2, %v598_v32  ;;  %v840_v34 = vpop.f32.mrb[12].mxu0 }
 0x119   : > { %647 = vst.msk [vmem:[%s1121_s21 + $0xc8] sm:$0xff] %vm621_vm2, %v614_v33  ;;  %v856_v35 = vpop.f32.mrb[12].mxu1  ;;  %v517_v36 = vadd.f32 %v840_v34, %v1111_v22  ;;  %v508_v38 = vpop.f32.mrb[13].mxu0 }
 0x11a   : > { %v581_v37 = vadd.f32 %v856_v35, %v1111_v22  ;;  %v572_v39 = vpop.f32.mrb[13].mxu1  ;;  %v509_v40 = vadd.f32 %v1111_v22, %v508_v38  ;;  %v841_v42 = vpop.f32.mrb[14].mxu0 }
 0x11b   : > { %v573_v41 = vadd.f32 %v1111_v22, %v572_v39  ;;  %v857_v43 = vpop.f32.mrb[14].mxu1  ;;  %v603_v44 = vmul.f32 %v1114_v24, %v517_v36  ;;  %v520_v46 = vadd.f32 %v841_v42, %v1111_v22  ;;  %v511_v48 = vpop.f32.mrb[15].mxu0 }
 0x11c   : > { %v619_v45 = vmul.f32 %v1114_v24, %v581_v37  ;;  %v584_v47 = vadd.f32 %v857_v43, %v1111_v22  ;;  %v575_v49 = vpop.f32.mrb[15].mxu1  ;;  %v601_v50 = vmul.f32 %v1114_v24, %v509_v40  ;;  %v512_v52 = vadd.f32 %v1111_v22, %v511_v48 }
 0x11d   : > { %v617_v51 = vmul.f32 %v1114_v24, %v573_v41  ;;  %v576_v53 = vadd.f32 %v1111_v22, %v575_v49  ;;  %636 = vst.msk [vmem:[%s1121_s21 + $0x70] sm:$0xff] %vm621_vm2, %v603_v44  ;;  %v604_v54 = vmul.f32 %v1114_v24, %v520_v46 }
 0x11e   : > { %652 = vst.msk [vmem:[%s1121_s21 + $0xf0] sm:$0xff] %vm621_vm2, %v619_v45  ;;  %v620_v55 = vmul.f32 %v1114_v24, %v584_v47  ;;  %634 = vst.msk [vmem:[%s1121_s21 + $0x60] sm:$0xff] %vm621_vm2, %v601_v50  ;;  %v602_v56 = vmul.f32 %v1114_v24, %v512_v52 }
 0x11f   : > { %650 = vst.msk [vmem:[%s1121_s21 + $0xe0] sm:$0xff] %vm621_vm2, %v617_v51  ;;  %v618_v57 = vmul.f32 %v1114_v24, %v576_v53  ;;  %637 = vst.msk [vmem:[%s1121_s21 + $0x78] sm:$0xff] %vm621_vm2, %v604_v54 }
 0x120   : > { %653 = vst.msk [vmem:[%s1121_s21 + $0xf8] sm:$0xff] %vm621_vm2, %v620_v55  ;;  %635 = vst.msk [vmem:[%s1121_s21 + $0x68] sm:$0xff] %vm621_vm2, %v602_v56 }
 0x121   : > { %651 = vst.msk [vmem:[%s1121_s21 + $0xe8] sm:$0xff] %vm621_vm2, %v618_v57 }
 0x122 PF: > { %s20_s23 = sadd.s32 1, %s984_s23   ;;  %s1269_s20 = smov %s976_s22 }
 0x123   : > { %p17_p12 = scmp.ge.s32.totalorder %s20_s23, 10   ;;  %s1270_s21 = smov %s980_s0 }
 0x124   : > { %s1271_s22 = smov %s1274_s24  ;;  %s1272_s0 = smov %s1278_s25 }
 0x125   :  { %19 = sbr.rel (!%p17_p12) target bundleno = 18 (0x12), region = 62 }

// kernel: spk_resblock_forward.17
= control target key start
LH: loop header
LB: loop body
LE: loop exit
PB: predicated region body
PF: predicated region fallthrough
CT: control target
= control target key end

     0   :  { %s480_s21 = smov 0   ;;  %s517_s0 = inlined_call_operand.vmem [shape: f32[128,128], index: 0, kind: input, shape index: {}]   ;;  %s518_s1 = inlined_call_operand.vmem [shape: f32[1,128], index: 1, kind: input, shape index: {}]   ;;  %s519_s2 = inlined_call_operand.vmem [shape: f32[1,128], index: 2, kind: input, shape index: {}]   ;;  %s520_s3 = inlined_call_operand.vmem [shape: f32[1,128], index: 3, kind: input, shape index: {}]   ;;  %s521_s4 = inlined_call_operand.vmem [shape: f32[1,128], index: 4, kind: input, shape index: {}]   ;;  %s522_s5 = inlined_call_operand.vmem [shape: f32[128,128], index: 5, kind: input, shape index: {}]   ;;  %s523_s6 = inlined_call_operand.vmem [shape: f32[128,128], index: 6, kind: output, shape index: {}]  }
   0x1 LB: > { %s414_s22 = sadd.s32 4294967295, %s443_s21   ;;  %p418_p0 = scmp.ge.s32.totalorder %s443_s21, 1  ;;  %s443_s21 = sphi %s480_s21, %s16_s21  }
   0x2   : > { %p224_p1 = scmp.lt.s32.totalorder %s443_s21, 3 }
   0x4   : > { %p225_p2 = pnand %p418_p0, %p224_p1 }
   0x5   : > { %s419_s23 = sshll.u32 (!%p225_p2), %s414_s22, 3  ;;  %v278_v0 = vld [vmem:[%s519_s2] sm:$0x1] (!%p225_p2)  ;;  %v295_v2 = vlaneseq (!%p225_p2) }
   0x6   : > { %228 = sbr.rel (%p225_p2) target bundleno = 35 (0x23), region = 44  ;;  %p260_p3 = scmp.lt.s32.totalorder (!%p225_p2), %s419_s23, 15  ;;  %v279_v1 = vadd.f32 (!%p225_p2), 1e-05, %v278_v0  ;;  %v277_v4 = vld [vmem:[%s520_s3] sm:$0x1] (!%p225_p2) }
   0x7   : > { %v296_v3 = vshrl.u32 (!%p225_p2), %v295_v2, 7  ;;  %v283_v7 = vld [vmem:[%s518_s1] sm:$0x1] (!%p225_p2) }
   0x8   : > { %435 = vrsqrt.f32 (!%p225_p2), %v279_v1  ;;  %v282_v9 = vld [vmem:[%s521_s4] sm:$0x1] (!%p225_p2) }
   0x9   : > { %v297_v5 = vsub.s32 (!%p225_p2), 0, %v296_v3 }
   0xd   : > { %s525_s23 = smov (!%p260_p3, %s419_s23), 15 }
   0xe   : > { %s491_s26 = sshll.u32 %s525_s23, 3 }
   0xf   : > { %s263_s29 = scalar_lea.vmem %s517_s0, %s491_s26  ;;  %s269_s14 = scalar_lea.vmem %s522_s5, %s491_s26 }
  0x10   : > { %v286_v10 = vld [vmem:[%s263_s29] sm:$0xff]  ;;  %v287_v11 = vld [vmem:[%s263_s29 + $0x8] sm:$0xff]  ;;  %v288_v12 = vld [vmem:[%s263_s29 + $0x10] sm:$0xff]  ;;  %s275_s17 = scalar_lea.vmem %s523_s6, %s491_s26 }
  0x11   : > { %v289_v13 = vld [vmem:[%s263_s29 + $0x18] sm:$0xff]  ;;  %v290_v16 = vld [vmem:[%s263_s29 + $0x20] sm:$0xff]  ;;  %v291_v17 = vld [vmem:[%s263_s29 + $0x28] sm:$0xff] }
  0x12   : > { %v436_v6 = vpop.eup %435  ;;  %v292_v18 = vld [vmem:[%s263_s29 + $0x30] sm:$0xff]  ;;  %v293_v19 = vld [vmem:[%s263_s29 + $0x38] sm:$0xff]  ;;  %v322_v29 = vld [vmem:[%s269_s14] sm:$0xff] }
  0x13   : > { %v281_v8 = vmul.f32 %v436_v6, %v277_v4  ;;  %v323_v30 = vld [vmem:[%s269_s14 + $0x8] sm:$0xff]  ;;  %v324_v32 = vld [vmem:[%s269_s14 + $0x10] sm:$0xff]  ;;  %v325_v33 = vld [vmem:[%s269_s14 + $0x18] sm:$0xff] }
  0x14   : > { %v326_v34 = vld [vmem:[%s269_s14 + $0x20] sm:$0xff]  ;;  %v327_v39 = vld [vmem:[%s269_s14 + $0x28] sm:$0xff]  ;;  %v328_v40 = vld [vmem:[%s269_s14 + $0x30] sm:$0xff] }
  0x15   : > { %v284_v14 = vmul.f32 %v283_v7, %v281_v8  ;;  %v298_v15 = vrot.slane %v281_v8, %v297_v5  ;;  %v329_v41 = vld [vmem:[%s269_s14 + $0x38] sm:$0xff] }
  0x17   : > { %v285_v20 = vsub.f32 %v282_v9, %v284_v14  ;;  %v300_v21 = vmul.f32 %v298_v15, %v286_v10  ;;  %v301_v22 = vmul.f32 %v298_v15, %v287_v11  ;;  %v302_v23 = vmul.f32 %v298_v15, %v288_v12 }
  0x18   : > { %v303_v24 = vmul.f32 %v298_v15, %v289_v13  ;;  %v304_v25 = vmul.f32 %v298_v15, %v290_v16  ;;  %v305_v26 = vmul.f32 %v298_v15, %v291_v17  ;;  %v306_v27 = vmul.f32 %v298_v15, %v292_v18 }
  0x19   : > { %v312_v28 = vrot.slane %v285_v20, %v297_v5  ;;  %v307_v31 = vmul.f32 %v298_v15, %v293_v19 }
  0x1b   : > { %v314_v35 = vadd.f32 %v312_v28, %v300_v21  ;;  %v315_v36 = vadd.f32 %v312_v28, %v301_v22  ;;  %v316_v37 = vadd.f32 %v312_v28, %v302_v23  ;;  %v317_v38 = vadd.f32 %v312_v28, %v303_v24 }
  0x1c   : > { %v318_v42 = vadd.f32 %v312_v28, %v304_v25  ;;  %v319_v43 = vadd.f32 %v312_v28, %v305_v26  ;;  %v320_v44 = vadd.f32 %v312_v28, %v306_v27  ;;  %v321_v45 = vadd.f32 %v312_v28, %v307_v31 }
  0x1d   : > { %v330_v46 = vadd.f32 %v322_v29, %v314_v35  ;;  %v331_v47 = vadd.f32 %v323_v30, %v315_v36  ;;  %v332_v48 = vadd.f32 %v324_v32, %v316_v37  ;;  %v333_v49 = vadd.f32 %v325_v33, %v317_v38 }
  0x1e   : > { %v334_v50 = vadd.f32 %v326_v34, %v318_v42  ;;  %v335_v51 = vadd.f32 %v327_v39, %v319_v43  ;;  %v336_v52 = vadd.f32 %v328_v40, %v320_v44  ;;  %v337_v53 = vadd.f32 %v329_v41, %v321_v45 }
  0x1f   : > { %338 = vst [vmem:[%s275_s17] sm:$0xff] %v330_v46  ;;  %339 = vst [vmem:[%s275_s17 + $0x8] sm:$0xff] %v331_v47 }
  0x20   : > { %340 = vst [vmem:[%s275_s17 + $0x10] sm:$0xff] %v332_v48  ;;  %341 = vst [vmem:[%s275_s17 + $0x18] sm:$0xff] %v333_v49 }
  0x21   : > { %342 = vst [vmem:[%s275_s17 + $0x20] sm:$0xff] %v334_v50  ;;  %343 = vst [vmem:[%s275_s17 + $0x28] sm:$0xff] %v335_v51 }
  0x22   : > { %344 = vst [vmem:[%s275_s17 + $0x30] sm:$0xff] %v336_v52  ;;  %345 = vst [vmem:[%s275_s17 + $0x38] sm:$0xff] %v337_v53 }
  0x23 PF: > { %s16_s21 = sadd.s32 1, %s443_s21  }
  0x24   : > { %p13_p4 = scmp.ge.s32.totalorder %s16_s21, 4  }
  0x26   :  { %15 = sbr.rel (!%p13_p4) target bundleno = 1 (0x1), region = 77 }

</bundles_post_ra>
